<compile_context>
chip_gen: v7x
topology: tpu7x:2x2x1
jax: 0.10.0
libtpu: 0.0.40
codegen_flags: <defaults>
</compile_context>

<pallas_src>
import math

import jax
import jax.numpy as jnp
from jax import lax
from jax.experimental import pallas as pl
from jax.experimental.pallas import tpu as pltpu

# ---- tiny BERT config -------------------------------------------------------
B, S, H = 2, 8, 32
BS = B * S
NUM_HEADS = 2
HEAD_DIM = H // NUM_HEADS
INTERMEDIATE = 64
NUM_LAYERS = 2
VOCAB = 50
TYPE_VOCAB = 2
MAX_POS = 16
LN_EPS = 1e-12
ATTN_SCALE = 1.0 / math.sqrt(HEAD_DIM)

# Packed embedding table rows: [word (VOCAB) | per-row position (BS, pre-tiled) | type]
E_ROWS = VOCAB + BS + TYPE_VOCAB
# Packed small-vector parameter table: 3 global rows + 8 rows per layer, width 3H.
VEC_ROWS = 3 + 8 * NUM_LAYERS
VEC_W = 3 * H


# ---- in-kernel helpers ------------------------------------------------------
def _layernorm(x, g, b):
    mu = jnp.mean(x, axis=-1, keepdims=True)
    var = jnp.mean((x - mu) ** 2, axis=-1, keepdims=True)
    return (x - mu) * lax.rsqrt(var + LN_EPS) * g + b


def _gelu(x):
    # TODO(synk): HF BERT uses exact erf GELU; tanh approximation (EUP-friendly) used here.
    return jax.nn.gelu(x, approximate=True)


# ---- single fused Pallas kernel ---------------------------------------------
def fused_bert_kernel(xint_ref, bias_ref, emb_ref, vec_ref,
                      wqkv_ref, wop_ref, wi_ref, wf_ref, o_ref):
    f32, bf16 = jnp.float32, jnp.bfloat16

    # ---- embeddings: one combined one-hot @ packed (word|pos|type) table -----
    ids = xint_ref[:, 0:1]                                   # (BS, 1) int32
    tt = xint_ref[:, 1:2]                                    # (BS, 1) int32
    col = lax.broadcasted_iota(jnp.int32, (BS, E_ROWS), 1)
    row = lax.broadcasted_iota(jnp.int32, (BS, E_ROWS), 0)
    onehot = (col == ids) | (col == VOCAB + row) | (col == VOCAB + BS + tt)
    onehot = jnp.where(onehot, 1.0, 0.0).astype(bf16)        # (BS, E_ROWS)
    emb = jnp.dot(onehot, emb_ref[...], preferred_element_type=f32)      # (BS, H) f32

    h = _layernorm(emb, vec_ref[0:1, :H], vec_ref[1:2, :H])  # embedding LayerNorm
    bias = bias_ref[...]                                     # (BS, BS) — layer-invariant

    for l in range(NUM_LAYERS):          # static unroll; weights stay VMEM-resident
        base = 3 + 8 * l
        bqkv = vec_ref[base:base + 1, :]                     # (1, 3H)
        bo = vec_ref[base + 1:base + 2, :H]
        g1 = vec_ref[base + 2:base + 3, :H]
        b1 = vec_ref[base + 3:base + 4, :H]
        bi = vec_ref[base + 4:base + 5, :INTERMEDIATE]
        bf_ = vec_ref[base + 5:base + 6, :H]
        g2 = vec_ref[base + 6:base + 7, :H]
        b2 = vec_ref[base + 7:base + 8, :H]

        wqkv_l = wqkv_ref[l]                                 # (H, 3H) bf16
        wo_l = wop_ref[l]                                    # (H, H)  bf16
        wi_l = wi_ref[l]                                     # (H, I)  bf16
        wf_l = wf_ref[l]                                     # (I, H)  bf16

        # Fused QKV projection: one (BS,H)@(H,3H) MXU push, 96 output lanes.
        qkv = jnp.dot(h.astype(bf16), wqkv_l, preferred_element_type=f32) + bqkv

        attn = None
        for hh in range(NUM_HEADS):                          # static; 2 heads
            lo = hh * HEAD_DIM
            q_h = qkv[:, lo:lo + HEAD_DIM]
            k_h = qkv[:, H + lo:H + lo + HEAD_DIM]
            v_h = qkv[:, 2 * H + lo:2 * H + lo + HEAD_DIM]
            # (BS, BS) scores for all batches at once; cross-batch blocks and padded
            # keys are killed by the additive block-diagonal bias.
            s = lax.dot_general(q_h.astype(bf16), k_h.astype(bf16),
                                (((1,), (1,)), ((), ())),
                                preferred_element_type=f32) * ATTN_SCALE + bias
            s = s - jnp.max(s, axis=-1, keepdims=True)
            p = jnp.exp(s)
            p = p / jnp.sum(p, axis=-1, keepdims=True)       # exact divide (parity)
            ctx = jnp.dot(p.astype(bf16), v_h.astype(bf16), preferred_element_type=f32)
            # ctx @ Wo == sum_h ctx_h @ Wo[h*hd:(h+1)*hd, :]  (no concat, no zero-init)
            part = jnp.dot(ctx.astype(bf16), wo_l[lo:lo + HEAD_DIM, :],
                           preferred_element_type=f32)
            attn = part if attn is None else attn + part
        attn = attn + bo

        x1 = _layernorm(h + attn, g1, b1)
        mid = _gelu(jnp.dot(x1.astype(bf16), wi_l, preferred_element_type=f32) + bi)
        ffn = jnp.dot(mid.astype(bf16), wf_l, preferred_element_type=f32) + bf_
        h = _layernorm(x1 + ffn, g2, b2)

    # Pooler: tanh(h @ Wp + bp) on all rows (trivially cheap), then two static
    # CLS-row stores — intermediate activations never touch HBM.
    pooled = jnp.tanh(jnp.dot(h.astype(bf16), wop_ref[NUM_LAYERS],
                              preferred_element_type=f32) + vec_ref[2:3, :H])
    for b in range(B):
        o_ref[b:b + 1, :] = pooled[b * S:b * S + 1, :]


def fused_bert_forward(xint, attn_bias, params):
    weights = (params['emb_table'], params['vec_params'], params['wqkv'],
               params['wo_pool'], params['wi'], params['wf'])
    n_in = 2 + len(weights)
    # No grid: single invocation, whole arrays resident in VMEM (total < 100 KB),
    # no pipeline prologue/epilogue, no per-step weight re-buffering.
    return pl.pallas_call(
        fused_bert_kernel,
        out_shape=jax.ShapeDtypeStruct((B, H), jnp.float32),
        in_specs=[pl.BlockSpec(memory_space=pltpu.MemorySpace.VMEM)] * n_in,
        out_specs=pl.BlockSpec(memory_space=pltpu.MemorySpace.VMEM),
    )(xint, attn_bias, *weights)


# ---- parameters (deterministic synthetic init, packed for the kernel) --------
def init_params(key):
    ks = jax.random.split(key, 8)

    def norm(k, shape):
        return (jax.random.normal(k, shape, jnp.float32) * 0.02).astype(jnp.bfloat16)

    L = NUM_LAYERS
    word_emb = norm(ks[0], (VOCAB, H))
    pos_emb = norm(ks[1], (MAX_POS, H))
    type_emb = norm(ks[2], (TYPE_VOCAB, H))
    # Row r of the position block holds pos_emb[r % S] -> in-kernel one-hot is col==VOCAB+row.
    pos_tiled = jnp.tile(pos_emb[:S], (B, 1))                       # (BS, H)
    emb_table = jnp.concatenate([word_emb, pos_tiled, type_emb], 0)  # (E_ROWS, H) bf16

    wqkv = norm(ks[3], (L, H, 3 * H))                                # fused Q|K|V
    wo = norm(ks[4], (L, H, H))
    wp = norm(ks[5], (H, H))                                         # pooler weight
    wo_pool = jnp.concatenate([wo, wp[None]], axis=0)                # (L+1, H, H) bf16
    wi = norm(ks[6], (L, H, INTERMEDIATE))
    wf = norm(ks[7], (L, INTERMEDIATE, H))

    # Packed small-vector table (f32): rows 0/1 = emb LN gamma/beta, row 2 = pooler bias,
    # then per layer: [bqkv, bo, ln1_g, ln1_b, bi, bf, ln2_g, ln2_b].
    vec = jnp.zeros((VEC_ROWS, VEC_W), jnp.float32)
    vec = vec.at[0, :H].set(1.0)                                     # emb LN gamma
    for l in range(L):
        base = 3 + 8 * l
        vec = vec.at[base + 2, :H].set(1.0)                          # ln1 gamma
        vec = vec.at[base + 6, :H].set(1.0)                          # ln2 gamma
        # all bias rows stay zero (matches synthetic zero-bias init)

    return dict(emb_table=emb_table, vec_params=vec, wqkv=wqkv,
                wo_pool=wo_pool, wi=wi, wf=wf)


# ---- BertFeatureWrapper.forward equivalent ----------------------------------
def bert_feature_wrapper_forward(params, x):
    # x: [B, S, C] int32, C in {2, 3}
    input_ids = x[:, :, 0]
    attention_mask = x[:, :, 1]
    if x.shape[-1] == 3:
        token_type_ids = x[:, :, 2]
    else:
        token_type_ids = jnp.zeros_like(input_ids)

    # Integer token features packed into one small VMEM input: [ids | token_type].
    xint = jnp.stack([input_ids.reshape(-1),
                      token_type_ids.reshape(-1)], axis=-1).astype(jnp.int32)   # (BS, 2)

    # Block-diagonal additive attention bias (batch separation + key-padding mask),
    # precomputed once host-side; 0 where attended, -1e9 elsewhere.  Shape (BS, BS).
    batch_of = jnp.arange(BS, dtype=jnp.int32) // S
    same_batch = batch_of[:, None] == batch_of[None, :]
    key_ok = attention_mask.reshape(-1)[None, :] > 0
    attn_bias = jnp.where(same_batch & key_ok, 0.0, -1e9).astype(jnp.float32)

    pooled = fused_bert_forward(xint, attn_bias, params)

    # self.dropout(pooler_output): nn.Dropout is identity in eval mode, so no-op.
    # TODO(synk): training-mode stochastic dropout not implemented (inference semantics).
    return pooled


# ---- main -------------------------------------------------------------------
if __name__ == "__main__":
    key = jax.random.PRNGKey(0)
    pkey, xkey = jax.random.split(key)
    params = init_params(pkey)

    ids = jax.random.randint(xkey, (B, S), 0, VOCAB, dtype=jnp.int32)
    attn_mask = jnp.ones((B, S), jnp.int32).at[1, 6:].set(0)   # pad last 2 tokens of batch 1
    ttype = jnp.zeros((B, S), jnp.int32).at[:, S // 2:].set(1)
    x = jnp.stack([ids, attn_mask, ttype], axis=-1)            # [B, S, 3] int32

    forward = jax.jit(bert_feature_wrapper_forward)
    out = forward(params, x)
    out = jax.block_until_ready(out)
    assert out.shape == (B, H) and out.dtype == jnp.float32
    print("KERNEL_OK")
</pallas_src>

<mosaic_0001>
module attributes {stable_mosaic.version = 11 : i64} {
  func.func @fused_bert_kernel(%arg0: memref<16x2xi32, #tpu.memory_space<vmem>>, %arg1: memref<16x16xf32, #tpu.memory_space<vmem>>, %arg2: memref<68x32xbf16, #tpu.memory_space<vmem>>, %arg3: memref<19x96xf32, #tpu.memory_space<vmem>>, %arg4: memref<2x32x96xbf16, #tpu.memory_space<vmem>>, %arg5: memref<3x32x32xbf16, #tpu.memory_space<vmem>>, %arg6: memref<2x32x64xbf16, #tpu.memory_space<vmem>>, %arg7: memref<2x64x32xbf16, #tpu.memory_space<vmem>>, %arg8: memref<2x32xf32, #tpu.memory_space<vmem>>) attributes {dimension_semantics = [], scalar_prefetch = 0 : i64, scratch_operands = 0 : i64, tpu.core_type = #tpu.core_type<tc>} {
    %c0 = arith.constant 0 : index
    %c0_0 = arith.constant 0 : index
    %0 = vector.load %arg0[%c0, %c0_0] : memref<16x2xi32, #tpu.memory_space<vmem>>, vector<16x1xi32>
    %c0_1 = arith.constant 0 : index
    %c1 = arith.constant 1 : index
    %1 = vector.load %arg0[%c0_1, %c1] : memref<16x2xi32, #tpu.memory_space<vmem>>, vector<16x1xi32>
    %2 = tpu.iota {dimensions = array<i32: 1>} : vector<16x68xi32>
    %3 = tpu.iota {dimensions = array<i32: 0>} : vector<16x68xi32>
    %4 = vector.broadcast %0 : vector<16x1xi32> to vector<16x68xi32>
    %5 = arith.cmpi eq, %2, %4 : vector<16x68xi32>
    %c50_i32 = arith.constant 50 : i32
    %6 = vector.broadcast %c50_i32 : i32 to vector<16x68xi32>
    %7 = arith.addi %6, %3 : vector<16x68xi32>
    %8 = arith.cmpi eq, %2, %7 : vector<16x68xi32>
    %9 = arith.ori %5, %8 : vector<16x68xi1>
    %c66_i32 = arith.constant 66 : i32
    %10 = vector.broadcast %c66_i32 : i32 to vector<16x1xi32>
    %11 = arith.addi %10, %1 : vector<16x1xi32>
    %12 = vector.broadcast %11 : vector<16x1xi32> to vector<16x68xi32>
    %13 = arith.cmpi eq, %2, %12 : vector<16x68xi32>
    %14 = arith.ori %9, %13 : vector<16x68xi1>
    %cst = arith.constant 1.000000e+00 : f32
    %cst_2 = arith.constant 0.000000e+00 : f32
    %15 = vector.broadcast %cst : f32 to vector<16x68xf32>
    %16 = vector.broadcast %cst_2 : f32 to vector<16x68xf32>
    %17 = arith.select %14, %15, %16 : vector<16x68xi1>, vector<16x68xf32>
    %18 = arith.truncf %17 : vector<16x68xf32> to vector<16x68xbf16>
    %c0_3 = arith.constant 0 : index
    %c0_4 = arith.constant 0 : index
    %19 = vector.load %arg2[%c0_3, %c0_4] : memref<68x32xbf16, #tpu.memory_space<vmem>>, vector<68x32xbf16>
    %cst_5 = arith.constant dense<0.000000e+00> : vector<16x32xf32>
    %20 = tpu.matmul %18, %19, %cst_5 {dimension_numbers = #tpu.dot_dimension_numbers<[1], [0], [0], [1], [0, 0, 1, 1], [], []>} : vector<16x68xbf16>, vector<68x32xbf16>, vector<16x32xf32> -> vector<16x32xf32>
    %c0_6 = arith.constant 0 : index
    %c0_7 = arith.constant 0 : index
    %21 = vector.load %arg3[%c0_6, %c0_7] : memref<19x96xf32, #tpu.memory_space<vmem>>, vector<1x32xf32>
    %c1_8 = arith.constant 1 : index
    %c0_9 = arith.constant 0 : index
    %22 = vector.load %arg3[%c1_8, %c0_9] : memref<19x96xf32, #tpu.memory_space<vmem>>, vector<1x32xf32>
    %cst_10 = arith.constant dense<0.000000e+00> : vector<16xf32>
    %23 = vector.multi_reduction <add>, %20, %cst_10 [1] : vector<16x32xf32> to vector<16xf32>
    %24 = vector.shape_cast %23 : vector<16xf32> to vector<16x1xf32>
    %cst_11 = arith.constant 3.200000e+01 : f32
    %25 = vector.broadcast %cst_11 : f32 to vector<16x1xf32>
    %26 = arith.divf %24, %25 : vector<16x1xf32>
    %27 = vector.broadcast %26 : vector<16x1xf32> to vector<16x32xf32>
    %28 = arith.subf %20, %27 : vector<16x32xf32>
    %29 = arith.mulf %28, %28 : vector<16x32xf32>
    %cst_12 = arith.constant dense<0.000000e+00> : vector<16xf32>
    %30 = vector.multi_reduction <add>, %29, %cst_12 [1] : vector<16x32xf32> to vector<16xf32>
    %31 = vector.shape_cast %30 : vector<16xf32> to vector<16x1xf32>
    %cst_13 = arith.constant 3.200000e+01 : f32
    %32 = vector.broadcast %cst_13 : f32 to vector<16x1xf32>
    %33 = arith.divf %31, %32 : vector<16x1xf32>
    %34 = vector.broadcast %26 : vector<16x1xf32> to vector<16x32xf32>
    %35 = arith.subf %20, %34 : vector<16x32xf32>
    %cst_14 = arith.constant 9.99999996E-13 : f32
    %36 = vector.broadcast %cst_14 : f32 to vector<16x1xf32>
    %37 = arith.addf %33, %36 : vector<16x1xf32>
    %38 = math.rsqrt %37 : vector<16x1xf32>
    %39 = vector.broadcast %38 : vector<16x1xf32> to vector<16x32xf32>
    %40 = arith.mulf %35, %39 : vector<16x32xf32>
    %41 = vector.broadcast %21 : vector<1x32xf32> to vector<16x32xf32>
    %42 = arith.mulf %40, %41 : vector<16x32xf32>
    %43 = vector.broadcast %22 : vector<1x32xf32> to vector<16x32xf32>
    %44 = arith.addf %42, %43 : vector<16x32xf32>
    %c0_15 = arith.constant 0 : index
    %c0_16 = arith.constant 0 : index
    %45 = vector.load %arg1[%c0_15, %c0_16] : memref<16x16xf32, #tpu.memory_space<vmem>>, vector<16x16xf32>
    %c3 = arith.constant 3 : index
    %c0_17 = arith.constant 0 : index
    %46 = vector.load %arg3[%c3, %c0_17] : memref<19x96xf32, #tpu.memory_space<vmem>>, vector<1x96xf32>
    %c4 = arith.constant 4 : index
    %c0_18 = arith.constant 0 : index
    %47 = vector.load %arg3[%c4, %c0_18] : memref<19x96xf32, #tpu.memory_space<vmem>>, vector<1x32xf32>
    %c5 = arith.constant 5 : index
    %c0_19 = arith.constant 0 : index
    %48 = vector.load %arg3[%c5, %c0_19] : memref<19x96xf32, #tpu.memory_space<vmem>>, vector<1x32xf32>
    %c6 = arith.constant 6 : index
    %c0_20 = arith.constant 0 : index
    %49 = vector.load %arg3[%c6, %c0_20] : memref<19x96xf32, #tpu.memory_space<vmem>>, vector<1x32xf32>
    %c7 = arith.constant 7 : index
    %c0_21 = arith.constant 0 : index
    %50 = vector.load %arg3[%c7, %c0_21] : memref<19x96xf32, #tpu.memory_space<vmem>>, vector<1x64xf32>
    %c8 = arith.constant 8 : index
    %c0_22 = arith.constant 0 : index
    %51 = vector.load %arg3[%c8, %c0_22] : memref<19x96xf32, #tpu.memory_space<vmem>>, vector<1x32xf32>
    %c9 = arith.constant 9 : index
    %c0_23 = arith.constant 0 : index
    %52 = vector.load %arg3[%c9, %c0_23] : memref<19x96xf32, #tpu.memory_space<vmem>>, vector<1x32xf32>
    %c10 = arith.constant 10 : index
    %c0_24 = arith.constant 0 : index
    %53 = vector.load %arg3[%c10, %c0_24] : memref<19x96xf32, #tpu.memory_space<vmem>>, vector<1x32xf32>
    %c0_25 = arith.constant 0 : index
    %c0_26 = arith.constant 0 : index
    %c0_27 = arith.constant 0 : index
    %54 = vector.load %arg4[%c0_25, %c0_26, %c0_27] : memref<2x32x96xbf16, #tpu.memory_space<vmem>>, vector<1x32x96xbf16>
    %55 = vector.shape_cast %54 : vector<1x32x96xbf16> to vector<32x96xbf16>
    %c0_28 = arith.constant 0 : index
    %c0_29 = arith.constant 0 : index
    %c0_30 = arith.constant 0 : index
    %56 = vector.load %arg5[%c0_28, %c0_29, %c0_30] : memref<3x32x32xbf16, #tpu.memory_space<vmem>>, vector<1x32x32xbf16>
    %57 = vector.shape_cast %56 : vector<1x32x32xbf16> to vector<32x32xbf16>
    %c0_31 = arith.constant 0 : index
    %c0_32 = arith.constant 0 : index
    %c0_33 = arith.constant 0 : index
    %58 = vector.load %arg6[%c0_31, %c0_32, %c0_33] : memref<2x32x64xbf16, #tpu.memory_space<vmem>>, vector<1x32x64xbf16>
    %59 = vector.shape_cast %58 : vector<1x32x64xbf16> to vector<32x64xbf16>
    %c0_34 = arith.constant 0 : index
    %c0_35 = arith.constant 0 : index
    %c0_36 = arith.constant 0 : index
    %60 = vector.load %arg7[%c0_34, %c0_35, %c0_36] : memref<2x64x32xbf16, #tpu.memory_space<vmem>>, vector<1x64x32xbf16>
    %61 = vector.shape_cast %60 : vector<1x64x32xbf16> to vector<64x32xbf16>
    %62 = arith.truncf %44 : vector<16x32xf32> to vector<16x32xbf16>
    %cst_37 = arith.constant dense<0.000000e+00> : vector<16x96xf32>
    %63 = tpu.matmul %62, %55, %cst_37 {dimension_numbers = #tpu.dot_dimension_numbers<[1], [0], [0], [1], [0, 0, 1, 1], [], []>} : vector<16x32xbf16>, vector<32x96xbf16>, vector<16x96xf32> -> vector<16x96xf32>
    %64 = vector.broadcast %46 : vector<1x96xf32> to vector<16x96xf32>
    %65 = arith.addf %63, %64 : vector<16x96xf32>
    %66 = vector.extract_strided_slice %65 {offsets = [0, 0], sizes = [16, 16], strides = [1, 1]} : vector<16x96xf32> to vector<16x16xf32>
    %67 = vector.extract_strided_slice %65 {offsets = [0, 32], sizes = [16, 16], strides = [1, 1]} : vector<16x96xf32> to vector<16x16xf32>
    %68 = vector.extract_strided_slice %65 {offsets = [0, 64], sizes = [16, 16], strides = [1, 1]} : vector<16x96xf32> to vector<16x16xf32>
    %69 = arith.truncf %66 : vector<16x16xf32> to vector<16x16xbf16>
    %70 = arith.truncf %67 : vector<16x16xf32> to vector<16x16xbf16>
    %cst_38 = arith.constant dense<0.000000e+00> : vector<16x16xf32>
    %71 = tpu.matmul %69, %70, %cst_38 {dimension_numbers = #tpu.dot_dimension_numbers<[1], [1], [0], [0], [0, 0, 1, 0], [], []>} : vector<16x16xbf16>, vector<16x16xbf16>, vector<16x16xf32> -> vector<16x16xf32>
    %cst_39 = arith.constant 2.500000e-01 : f32
    %72 = vector.broadcast %cst_39 : f32 to vector<16x16xf32>
    %73 = arith.mulf %71, %72 : vector<16x16xf32>
    %74 = arith.addf %73, %45 : vector<16x16xf32>
    %cst_40 = arith.constant dense<0xFF800000> : vector<16xf32>
    %75 = vector.multi_reduction <maximumf>, %74, %cst_40 [1] : vector<16x16xf32> to vector<16xf32>
    %76 = vector.shape_cast %75 : vector<16xf32> to vector<16x1xf32>
    %77 = vector.broadcast %76 : vector<16x1xf32> to vector<16x16xf32>
    %78 = arith.subf %74, %77 : vector<16x16xf32>
    %79 = math.exp %78 : vector<16x16xf32>
    %cst_41 = arith.constant dense<0.000000e+00> : vector<16xf32>
    %80 = vector.multi_reduction <add>, %79, %cst_41 [1] : vector<16x16xf32> to vector<16xf32>
    %81 = vector.shape_cast %80 : vector<16xf32> to vector<16x1xf32>
    %82 = vector.broadcast %81 : vector<16x1xf32> to vector<16x16xf32>
    %83 = arith.divf %79, %82 : vector<16x16xf32>
    %84 = arith.truncf %83 : vector<16x16xf32> to vector<16x16xbf16>
    %85 = arith.truncf %68 : vector<16x16xf32> to vector<16x16xbf16>
    %cst_42 = arith.constant dense<0.000000e+00> : vector<16x16xf32>
    %86 = tpu.matmul %84, %85, %cst_42 {dimension_numbers = #tpu.dot_dimension_numbers<[1], [0], [0], [1], [0, 0, 1, 1], [], []>} : vector<16x16xbf16>, vector<16x16xbf16>, vector<16x16xf32> -> vector<16x16xf32>
    %87 = arith.truncf %86 : vector<16x16xf32> to vector<16x16xbf16>
    %88 = vector.extract_strided_slice %57 {offsets = [0, 0], sizes = [16, 32], strides = [1, 1]} : vector<32x32xbf16> to vector<16x32xbf16>
    %cst_43 = arith.constant dense<0.000000e+00> : vector<16x32xf32>
    %89 = tpu.matmul %87, %88, %cst_43 {dimension_numbers = #tpu.dot_dimension_numbers<[1], [0], [0], [1], [0, 0, 1, 1], [], []>} : vector<16x16xbf16>, vector<16x32xbf16>, vector<16x32xf32> -> vector<16x32xf32>
    %90 = vector.extract_strided_slice %65 {offsets = [0, 16], sizes = [16, 16], strides = [1, 1]} : vector<16x96xf32> to vector<16x16xf32>
    %91 = vector.extract_strided_slice %65 {offsets = [0, 48], sizes = [16, 16], strides = [1, 1]} : vector<16x96xf32> to vector<16x16xf32>
    %92 = vector.extract_strided_slice %65 {offsets = [0, 80], sizes = [16, 16], strides = [1, 1]} : vector<16x96xf32> to vector<16x16xf32>
    %93 = arith.truncf %90 : vector<16x16xf32> to vector<16x16xbf16>
    %94 = arith.truncf %91 : vector<16x16xf32> to vector<16x16xbf16>
    %cst_44 = arith.constant dense<0.000000e+00> : vector<16x16xf32>
    %95 = tpu.matmul %93, %94, %cst_44 {dimension_numbers = #tpu.dot_dimension_numbers<[1], [1], [0], [0], [0, 0, 1, 0], [], []>} : vector<16x16xbf16>, vector<16x16xbf16>, vector<16x16xf32> -> vector<16x16xf32>
    %cst_45 = arith.constant 2.500000e-01 : f32
    %96 = vector.broadcast %cst_45 : f32 to vector<16x16xf32>
    %97 = arith.mulf %95, %96 : vector<16x16xf32>
    %98 = arith.addf %97, %45 : vector<16x16xf32>
    %cst_46 = arith.constant dense<0xFF800000> : vector<16xf32>
    %99 = vector.multi_reduction <maximumf>, %98, %cst_46 [1] : vector<16x16xf32> to vector<16xf32>
    %100 = vector.shape_cast %99 : vector<16xf32> to vector<16x1xf32>
    %101 = vector.broadcast %100 : vector<16x1xf32> to vector<16x16xf32>
    %102 = arith.subf %98, %101 : vector<16x16xf32>
    %103 = math.exp %102 : vector<16x16xf32>
    %cst_47 = arith.constant dense<0.000000e+00> : vector<16xf32>
    %104 = vector.multi_reduction <add>, %103, %cst_47 [1] : vector<16x16xf32> to vector<16xf32>
    %105 = vector.shape_cast %104 : vector<16xf32> to vector<16x1xf32>
    %106 = vector.broadcast %105 : vector<16x1xf32> to vector<16x16xf32>
    %107 = arith.divf %103, %106 : vector<16x16xf32>
    %108 = arith.truncf %107 : vector<16x16xf32> to vector<16x16xbf16>
    %109 = arith.truncf %92 : vector<16x16xf32> to vector<16x16xbf16>
    %cst_48 = arith.constant dense<0.000000e+00> : vector<16x16xf32>
    %110 = tpu.matmul %108, %109, %cst_48 {dimension_numbers = #tpu.dot_dimension_numbers<[1], [0], [0], [1], [0, 0, 1, 1], [], []>} : vector<16x16xbf16>, vector<16x16xbf16>, vector<16x16xf32> -> vector<16x16xf32>
    %111 = arith.truncf %110 : vector<16x16xf32> to vector<16x16xbf16>
    %112 = vector.extract_strided_slice %57 {offsets = [16, 0], sizes = [16, 32], strides = [1, 1]} : vector<32x32xbf16> to vector<16x32xbf16>
    %cst_49 = arith.constant dense<0.000000e+00> : vector<16x32xf32>
    %113 = tpu.matmul %111, %112, %cst_49 {dimension_numbers = #tpu.dot_dimension_numbers<[1], [0], [0], [1], [0, 0, 1, 1], [], []>} : vector<16x16xbf16>, vector<16x32xbf16>, vector<16x32xf32> -> vector<16x32xf32>
    %114 = arith.addf %89, %113 : vector<16x32xf32>
    %115 = vector.broadcast %47 : vector<1x32xf32> to vector<16x32xf32>
    %116 = arith.addf %114, %115 : vector<16x32xf32>
    %117 = arith.addf %44, %116 : vector<16x32xf32>
    %cst_50 = arith.constant dense<0.000000e+00> : vector<16xf32>
    %118 = vector.multi_reduction <add>, %117, %cst_50 [1] : vector<16x32xf32> to vector<16xf32>
    %119 = vector.shape_cast %118 : vector<16xf32> to vector<16x1xf32>
    %cst_51 = arith.constant 3.200000e+01 : f32
    %120 = vector.broadcast %cst_51 : f32 to vector<16x1xf32>
    %121 = arith.divf %119, %120 : vector<16x1xf32>
    %122 = vector.broadcast %121 : vector<16x1xf32> to vector<16x32xf32>
    %123 = arith.subf %117, %122 : vector<16x32xf32>
    %124 = arith.mulf %123, %123 : vector<16x32xf32>
    %cst_52 = arith.constant dense<0.000000e+00> : vector<16xf32>
    %125 = vector.multi_reduction <add>, %124, %cst_52 [1] : vector<16x32xf32> to vector<16xf32>
    %126 = vector.shape_cast %125 : vector<16xf32> to vector<16x1xf32>
    %cst_53 = arith.constant 3.200000e+01 : f32
    %127 = vector.broadcast %cst_53 : f32 to vector<16x1xf32>
    %128 = arith.divf %126, %127 : vector<16x1xf32>
    %129 = vector.broadcast %121 : vector<16x1xf32> to vector<16x32xf32>
    %130 = arith.subf %117, %129 : vector<16x32xf32>
    %cst_54 = arith.constant 9.99999996E-13 : f32
    %131 = vector.broadcast %cst_54 : f32 to vector<16x1xf32>
    %132 = arith.addf %128, %131 : vector<16x1xf32>
    %133 = math.rsqrt %132 : vector<16x1xf32>
    %134 = vector.broadcast %133 : vector<16x1xf32> to vector<16x32xf32>
    %135 = arith.mulf %130, %134 : vector<16x32xf32>
    %136 = vector.broadcast %48 : vector<1x32xf32> to vector<16x32xf32>
    %137 = arith.mulf %135, %136 : vector<16x32xf32>
    %138 = vector.broadcast %49 : vector<1x32xf32> to vector<16x32xf32>
    %139 = arith.addf %137, %138 : vector<16x32xf32>
    %140 = arith.truncf %139 : vector<16x32xf32> to vector<16x32xbf16>
    %cst_55 = arith.constant dense<0.000000e+00> : vector<16x64xf32>
    %141 = tpu.matmul %140, %59, %cst_55 {dimension_numbers = #tpu.dot_dimension_numbers<[1], [0], [0], [1], [0, 0, 1, 1], [], []>} : vector<16x32xbf16>, vector<32x64xbf16>, vector<16x64xf32> -> vector<16x64xf32>
    %142 = vector.broadcast %50 : vector<1x64xf32> to vector<16x64xf32>
    %143 = arith.addf %141, %142 : vector<16x64xf32>
    %144 = arith.mulf %143, %143 : vector<16x64xf32>
    %145 = arith.mulf %143, %144 : vector<16x64xf32>
    %cst_56 = arith.constant 4.471500e-02 : f32
    %146 = vector.broadcast %cst_56 : f32 to vector<16x64xf32>
    %147 = arith.mulf %146, %145 : vector<16x64xf32>
    %148 = arith.addf %143, %147 : vector<16x64xf32>
    %cst_57 = arith.constant 0.797884583 : f32
    %149 = vector.broadcast %cst_57 : f32 to vector<16x64xf32>
    %150 = arith.mulf %149, %148 : vector<16x64xf32>
    %151 = math.tanh %150 : vector<16x64xf32>
    %cst_58 = arith.constant 1.000000e+00 : f32
    %152 = vector.broadcast %cst_58 : f32 to vector<16x64xf32>
    %153 = arith.addf %152, %151 : vector<16x64xf32>
    %cst_59 = arith.constant 5.000000e-01 : f32
    %154 = vector.broadcast %cst_59 : f32 to vector<16x64xf32>
    %155 = arith.mulf %154, %153 : vector<16x64xf32>
    %156 = arith.mulf %143, %155 : vector<16x64xf32>
    %157 = arith.truncf %156 : vector<16x64xf32> to vector<16x64xbf16>
    %cst_60 = arith.constant dense<0.000000e+00> : vector<16x32xf32>
    %158 = tpu.matmul %157, %61, %cst_60 {dimension_numbers = #tpu.dot_dimension_numbers<[1], [0], [0], [1], [0, 0, 1, 1], [], []>} : vector<16x64xbf16>, vector<64x32xbf16>, vector<16x32xf32> -> vector<16x32xf32>
    %159 = vector.broadcast %51 : vector<1x32xf32> to vector<16x32xf32>
    %160 = arith.addf %158, %159 : vector<16x32xf32>
    %161 = arith.addf %139, %160 : vector<16x32xf32>
    %cst_61 = arith.constant dense<0.000000e+00> : vector<16xf32>
    %162 = vector.multi_reduction <add>, %161, %cst_61 [1] : vector<16x32xf32> to vector<16xf32>
    %163 = vector.shape_cast %162 : vector<16xf32> to vector<16x1xf32>
    %cst_62 = arith.constant 3.200000e+01 : f32
    %164 = vector.broadcast %cst_62 : f32 to vector<16x1xf32>
    %165 = arith.divf %163, %164 : vector<16x1xf32>
    %166 = vector.broadcast %165 : vector<16x1xf32> to vector<16x32xf32>
    %167 = arith.subf %161, %166 : vector<16x32xf32>
    %168 = arith.mulf %167, %167 : vector<16x32xf32>
    %cst_63 = arith.constant dense<0.000000e+00> : vector<16xf32>
    %169 = vector.multi_reduction <add>, %168, %cst_63 [1] : vector<16x32xf32> to vector<16xf32>
    %170 = vector.shape_cast %169 : vector<16xf32> to vector<16x1xf32>
    %cst_64 = arith.constant 3.200000e+01 : f32
    %171 = vector.broadcast %cst_64 : f32 to vector<16x1xf32>
    %172 = arith.divf %170, %171 : vector<16x1xf32>
    %173 = vector.broadcast %165 : vector<16x1xf32> to vector<16x32xf32>
    %174 = arith.subf %161, %173 : vector<16x32xf32>
    %cst_65 = arith.constant 9.99999996E-13 : f32
    %175 = vector.broadcast %cst_65 : f32 to vector<16x1xf32>
    %176 = arith.addf %172, %175 : vector<16x1xf32>
    %177 = math.rsqrt %176 : vector<16x1xf32>
    %178 = vector.broadcast %177 : vector<16x1xf32> to vector<16x32xf32>
    %179 = arith.mulf %174, %178 : vector<16x32xf32>
    %180 = vector.broadcast %52 : vector<1x32xf32> to vector<16x32xf32>
    %181 = arith.mulf %179, %180 : vector<16x32xf32>
    %182 = vector.broadcast %53 : vector<1x32xf32> to vector<16x32xf32>
    %183 = arith.addf %181, %182 : vector<16x32xf32>
    %c11 = arith.constant 11 : index
    %c0_66 = arith.constant 0 : index
    %184 = vector.load %arg3[%c11, %c0_66] : memref<19x96xf32, #tpu.memory_space<vmem>>, vector<1x96xf32>
    %c12 = arith.constant 12 : index
    %c0_67 = arith.constant 0 : index
    %185 = vector.load %arg3[%c12, %c0_67] : memref<19x96xf32, #tpu.memory_space<vmem>>, vector<1x32xf32>
    %c13 = arith.constant 13 : index
    %c0_68 = arith.constant 0 : index
    %186 = vector.load %arg3[%c13, %c0_68] : memref<19x96xf32, #tpu.memory_space<vmem>>, vector<1x32xf32>
    %c14 = arith.constant 14 : index
    %c0_69 = arith.constant 0 : index
    %187 = vector.load %arg3[%c14, %c0_69] : memref<19x96xf32, #tpu.memory_space<vmem>>, vector<1x32xf32>
    %c15 = arith.constant 15 : index
    %c0_70 = arith.constant 0 : index
    %188 = vector.load %arg3[%c15, %c0_70] : memref<19x96xf32, #tpu.memory_space<vmem>>, vector<1x64xf32>
    %c16 = arith.constant 16 : index
    %c0_71 = arith.constant 0 : index
    %189 = vector.load %arg3[%c16, %c0_71] : memref<19x96xf32, #tpu.memory_space<vmem>>, vector<1x32xf32>
    %c17 = arith.constant 17 : index
    %c0_72 = arith.constant 0 : index
    %190 = vector.load %arg3[%c17, %c0_72] : memref<19x96xf32, #tpu.memory_space<vmem>>, vector<1x32xf32>
    %c18 = arith.constant 18 : index
    %c0_73 = arith.constant 0 : index
    %191 = vector.load %arg3[%c18, %c0_73] : memref<19x96xf32, #tpu.memory_space<vmem>>, vector<1x32xf32>
    %c1_74 = arith.constant 1 : index
    %c0_75 = arith.constant 0 : index
    %c0_76 = arith.constant 0 : index
    %192 = vector.load %arg4[%c1_74, %c0_75, %c0_76] : memref<2x32x96xbf16, #tpu.memory_space<vmem>>, vector<1x32x96xbf16>
    %193 = vector.shape_cast %192 : vector<1x32x96xbf16> to vector<32x96xbf16>
    %c1_77 = arith.constant 1 : index
    %c0_78 = arith.constant 0 : index
    %c0_79 = arith.constant 0 : index
    %194 = vector.load %arg5[%c1_77, %c0_78, %c0_79] : memref<3x32x32xbf16, #tpu.memory_space<vmem>>, vector<1x32x32xbf16>
    %195 = vector.shape_cast %194 : vector<1x32x32xbf16> to vector<32x32xbf16>
    %c1_80 = arith.constant 1 : index
    %c0_81 = arith.constant 0 : index
    %c0_82 = arith.constant 0 : index
    %196 = vector.load %arg6[%c1_80, %c0_81, %c0_82] : memref<2x32x64xbf16, #tpu.memory_space<vmem>>, vector<1x32x64xbf16>
    %197 = vector.shape_cast %196 : vector<1x32x64xbf16> to vector<32x64xbf16>
    %c1_83 = arith.constant 1 : index
    %c0_84 = arith.constant 0 : index
    %c0_85 = arith.constant 0 : index
    %198 = vector.load %arg7[%c1_83, %c0_84, %c0_85] : memref<2x64x32xbf16, #tpu.memory_space<vmem>>, vector<1x64x32xbf16>
    %199 = vector.shape_cast %198 : vector<1x64x32xbf16> to vector<64x32xbf16>
    %200 = arith.truncf %183 : vector<16x32xf32> to vector<16x32xbf16>
    %cst_86 = arith.constant dense<0.000000e+00> : vector<16x96xf32>
    %201 = tpu.matmul %200, %193, %cst_86 {dimension_numbers = #tpu.dot_dimension_numbers<[1], [0], [0], [1], [0, 0, 1, 1], [], []>} : vector<16x32xbf16>, vector<32x96xbf16>, vector<16x96xf32> -> vector<16x96xf32>
    %202 = vector.broadcast %184 : vector<1x96xf32> to vector<16x96xf32>
    %203 = arith.addf %201, %202 : vector<16x96xf32>
    %204 = vector.extract_strided_slice %203 {offsets = [0, 0], sizes = [16, 16], strides = [1, 1]} : vector<16x96xf32> to vector<16x16xf32>
    %205 = vector.extract_strided_slice %203 {offsets = [0, 32], sizes = [16, 16], strides = [1, 1]} : vector<16x96xf32> to vector<16x16xf32>
    %206 = vector.extract_strided_slice %203 {offsets = [0, 64], sizes = [16, 16], strides = [1, 1]} : vector<16x96xf32> to vector<16x16xf32>
    %207 = arith.truncf %204 : vector<16x16xf32> to vector<16x16xbf16>
    %208 = arith.truncf %205 : vector<16x16xf32> to vector<16x16xbf16>
    %cst_87 = arith.constant dense<0.000000e+00> : vector<16x16xf32>
    %209 = tpu.matmul %207, %208, %cst_87 {dimension_numbers = #tpu.dot_dimension_numbers<[1], [1], [0], [0], [0, 0, 1, 0], [], []>} : vector<16x16xbf16>, vector<16x16xbf16>, vector<16x16xf32> -> vector<16x16xf32>
    %cst_88 = arith.constant 2.500000e-01 : f32
    %210 = vector.broadcast %cst_88 : f32 to vector<16x16xf32>
    %211 = arith.mulf %209, %210 : vector<16x16xf32>
    %212 = arith.addf %211, %45 : vector<16x16xf32>
    %cst_89 = arith.constant dense<0xFF800000> : vector<16xf32>
    %213 = vector.multi_reduction <maximumf>, %212, %cst_89 [1] : vector<16x16xf32> to vector<16xf32>
    %214 = vector.shape_cast %213 : vector<16xf32> to vector<16x1xf32>
    %215 = vector.broadcast %214 : vector<16x1xf32> to vector<16x16xf32>
    %216 = arith.subf %212, %215 : vector<16x16xf32>
    %217 = math.exp %216 : vector<16x16xf32>
    %cst_90 = arith.constant dense<0.000000e+00> : vector<16xf32>
    %218 = vector.multi_reduction <add>, %217, %cst_90 [1] : vector<16x16xf32> to vector<16xf32>
    %219 = vector.shape_cast %218 : vector<16xf32> to vector<16x1xf32>
    %220 = vector.broadcast %219 : vector<16x1xf32> to vector<16x16xf32>
    %221 = arith.divf %217, %220 : vector<16x16xf32>
    %222 = arith.truncf %221 : vector<16x16xf32> to vector<16x16xbf16>
    %223 = arith.truncf %206 : vector<16x16xf32> to vector<16x16xbf16>
    %cst_91 = arith.constant dense<0.000000e+00> : vector<16x16xf32>
    %224 = tpu.matmul %222, %223, %cst_91 {dimension_numbers = #tpu.dot_dimension_numbers<[1], [0], [0], [1], [0, 0, 1, 1], [], []>} : vector<16x16xbf16>, vector<16x16xbf16>, vector<16x16xf32> -> vector<16x16xf32>
    %225 = arith.truncf %224 : vector<16x16xf32> to vector<16x16xbf16>
    %226 = vector.extract_strided_slice %195 {offsets = [0, 0], sizes = [16, 32], strides = [1, 1]} : vector<32x32xbf16> to vector<16x32xbf16>
    %cst_92 = arith.constant dense<0.000000e+00> : vector<16x32xf32>
    %227 = tpu.matmul %225, %226, %cst_92 {dimension_numbers = #tpu.dot_dimension_numbers<[1], [0], [0], [1], [0, 0, 1, 1], [], []>} : vector<16x16xbf16>, vector<16x32xbf16>, vector<16x32xf32> -> vector<16x32xf32>
    %228 = vector.extract_strided_slice %203 {offsets = [0, 16], sizes = [16, 16], strides = [1, 1]} : vector<16x96xf32> to vector<16x16xf32>
    %229 = vector.extract_strided_slice %203 {offsets = [0, 48], sizes = [16, 16], strides = [1, 1]} : vector<16x96xf32> to vector<16x16xf32>
    %230 = vector.extract_strided_slice %203 {offsets = [0, 80], sizes = [16, 16], strides = [1, 1]} : vector<16x96xf32> to vector<16x16xf32>
    %231 = arith.truncf %228 : vector<16x16xf32> to vector<16x16xbf16>
    %232 = arith.truncf %229 : vector<16x16xf32> to vector<16x16xbf16>
    %cst_93 = arith.constant dense<0.000000e+00> : vector<16x16xf32>
    %233 = tpu.matmul %231, %232, %cst_93 {dimension_numbers = #tpu.dot_dimension_numbers<[1], [1], [0], [0], [0, 0, 1, 0], [], []>} : vector<16x16xbf16>, vector<16x16xbf16>, vector<16x16xf32> -> vector<16x16xf32>
    %cst_94 = arith.constant 2.500000e-01 : f32
    %234 = vector.broadcast %cst_94 : f32 to vector<16x16xf32>
    %235 = arith.mulf %233, %234 : vector<16x16xf32>
    %236 = arith.addf %235, %45 : vector<16x16xf32>
    %cst_95 = arith.constant dense<0xFF800000> : vector<16xf32>
    %237 = vector.multi_reduction <maximumf>, %236, %cst_95 [1] : vector<16x16xf32> to vector<16xf32>
    %238 = vector.shape_cast %237 : vector<16xf32> to vector<16x1xf32>
    %239 = vector.broadcast %238 : vector<16x1xf32> to vector<16x16xf32>
    %240 = arith.subf %236, %239 : vector<16x16xf32>
    %241 = math.exp %240 : vector<16x16xf32>
    %cst_96 = arith.constant dense<0.000000e+00> : vector<16xf32>
    %242 = vector.multi_reduction <add>, %241, %cst_96 [1] : vector<16x16xf32> to vector<16xf32>
    %243 = vector.shape_cast %242 : vector<16xf32> to vector<16x1xf32>
    %244 = vector.broadcast %243 : vector<16x1xf32> to vector<16x16xf32>
    %245 = arith.divf %241, %244 : vector<16x16xf32>
    %246 = arith.truncf %245 : vector<16x16xf32> to vector<16x16xbf16>
    %247 = arith.truncf %230 : vector<16x16xf32> to vector<16x16xbf16>
    %cst_97 = arith.constant dense<0.000000e+00> : vector<16x16xf32>
    %248 = tpu.matmul %246, %247, %cst_97 {dimension_numbers = #tpu.dot_dimension_numbers<[1], [0], [0], [1], [0, 0, 1, 1], [], []>} : vector<16x16xbf16>, vector<16x16xbf16>, vector<16x16xf32> -> vector<16x16xf32>
    %249 = arith.truncf %248 : vector<16x16xf32> to vector<16x16xbf16>
    %250 = vector.extract_strided_slice %195 {offsets = [16, 0], sizes = [16, 32], strides = [1, 1]} : vector<32x32xbf16> to vector<16x32xbf16>
    %cst_98 = arith.constant dense<0.000000e+00> : vector<16x32xf32>
    %251 = tpu.matmul %249, %250, %cst_98 {dimension_numbers = #tpu.dot_dimension_numbers<[1], [0], [0], [1], [0, 0, 1, 1], [], []>} : vector<16x16xbf16>, vector<16x32xbf16>, vector<16x32xf32> -> vector<16x32xf32>
    %252 = arith.addf %227, %251 : vector<16x32xf32>
    %253 = vector.broadcast %185 : vector<1x32xf32> to vector<16x32xf32>
    %254 = arith.addf %252, %253 : vector<16x32xf32>
    %255 = arith.addf %183, %254 : vector<16x32xf32>
    %cst_99 = arith.constant dense<0.000000e+00> : vector<16xf32>
    %256 = vector.multi_reduction <add>, %255, %cst_99 [1] : vector<16x32xf32> to vector<16xf32>
    %257 = vector.shape_cast %256 : vector<16xf32> to vector<16x1xf32>
    %cst_100 = arith.constant 3.200000e+01 : f32
    %258 = vector.broadcast %cst_100 : f32 to vector<16x1xf32>
    %259 = arith.divf %257, %258 : vector<16x1xf32>
    %260 = vector.broadcast %259 : vector<16x1xf32> to vector<16x32xf32>
    %261 = arith.subf %255, %260 : vector<16x32xf32>
    %262 = arith.mulf %261, %261 : vector<16x32xf32>
    %cst_101 = arith.constant dense<0.000000e+00> : vector<16xf32>
    %263 = vector.multi_reduction <add>, %262, %cst_101 [1] : vector<16x32xf32> to vector<16xf32>
    %264 = vector.shape_cast %263 : vector<16xf32> to vector<16x1xf32>
    %cst_102 = arith.constant 3.200000e+01 : f32
    %265 = vector.broadcast %cst_102 : f32 to vector<16x1xf32>
    %266 = arith.divf %264, %265 : vector<16x1xf32>
    %267 = vector.broadcast %259 : vector<16x1xf32> to vector<16x32xf32>
    %268 = arith.subf %255, %267 : vector<16x32xf32>
    %cst_103 = arith.constant 9.99999996E-13 : f32
    %269 = vector.broadcast %cst_103 : f32 to vector<16x1xf32>
    %270 = arith.addf %266, %269 : vector<16x1xf32>
    %271 = math.rsqrt %270 : vector<16x1xf32>
    %272 = vector.broadcast %271 : vector<16x1xf32> to vector<16x32xf32>
    %273 = arith.mulf %268, %272 : vector<16x32xf32>
    %274 = vector.broadcast %186 : vector<1x32xf32> to vector<16x32xf32>
    %275 = arith.mulf %273, %274 : vector<16x32xf32>
    %276 = vector.broadcast %187 : vector<1x32xf32> to vector<16x32xf32>
    %277 = arith.addf %275, %276 : vector<16x32xf32>
    %278 = arith.truncf %277 : vector<16x32xf32> to vector<16x32xbf16>
    %cst_104 = arith.constant dense<0.000000e+00> : vector<16x64xf32>
    %279 = tpu.matmul %278, %197, %cst_104 {dimension_numbers = #tpu.dot_dimension_numbers<[1], [0], [0], [1], [0, 0, 1, 1], [], []>} : vector<16x32xbf16>, vector<32x64xbf16>, vector<16x64xf32> -> vector<16x64xf32>
    %280 = vector.broadcast %188 : vector<1x64xf32> to vector<16x64xf32>
    %281 = arith.addf %279, %280 : vector<16x64xf32>
    %282 = arith.mulf %281, %281 : vector<16x64xf32>
    %283 = arith.mulf %281, %282 : vector<16x64xf32>
    %cst_105 = arith.constant 4.471500e-02 : f32
    %284 = vector.broadcast %cst_105 : f32 to vector<16x64xf32>
    %285 = arith.mulf %284, %283 : vector<16x64xf32>
    %286 = arith.addf %281, %285 : vector<16x64xf32>
    %cst_106 = arith.constant 0.797884583 : f32
    %287 = vector.broadcast %cst_106 : f32 to vector<16x64xf32>
    %288 = arith.mulf %287, %286 : vector<16x64xf32>
    %289 = math.tanh %288 : vector<16x64xf32>
    %cst_107 = arith.constant 1.000000e+00 : f32
    %290 = vector.broadcast %cst_107 : f32 to vector<16x64xf32>
    %291 = arith.addf %290, %289 : vector<16x64xf32>
    %cst_108 = arith.constant 5.000000e-01 : f32
    %292 = vector.broadcast %cst_108 : f32 to vector<16x64xf32>
    %293 = arith.mulf %292, %291 : vector<16x64xf32>
    %294 = arith.mulf %281, %293 : vector<16x64xf32>
    %295 = arith.truncf %294 : vector<16x64xf32> to vector<16x64xbf16>
    %cst_109 = arith.constant dense<0.000000e+00> : vector<16x32xf32>
    %296 = tpu.matmul %295, %199, %cst_109 {dimension_numbers = #tpu.dot_dimension_numbers<[1], [0], [0], [1], [0, 0, 1, 1], [], []>} : vector<16x64xbf16>, vector<64x32xbf16>, vector<16x32xf32> -> vector<16x32xf32>
    %297 = vector.broadcast %189 : vector<1x32xf32> to vector<16x32xf32>
    %298 = arith.addf %296, %297 : vector<16x32xf32>
    %299 = arith.addf %277, %298 : vector<16x32xf32>
    %cst_110 = arith.constant dense<0.000000e+00> : vector<16xf32>
    %300 = vector.multi_reduction <add>, %299, %cst_110 [1] : vector<16x32xf32> to vector<16xf32>
    %301 = vector.shape_cast %300 : vector<16xf32> to vector<16x1xf32>
    %cst_111 = arith.constant 3.200000e+01 : f32
    %302 = vector.broadcast %cst_111 : f32 to vector<16x1xf32>
    %303 = arith.divf %301, %302 : vector<16x1xf32>
    %304 = vector.broadcast %303 : vector<16x1xf32> to vector<16x32xf32>
    %305 = arith.subf %299, %304 : vector<16x32xf32>
    %306 = arith.mulf %305, %305 : vector<16x32xf32>
    %cst_112 = arith.constant dense<0.000000e+00> : vector<16xf32>
    %307 = vector.multi_reduction <add>, %306, %cst_112 [1] : vector<16x32xf32> to vector<16xf32>
    %308 = vector.shape_cast %307 : vector<16xf32> to vector<16x1xf32>
    %cst_113 = arith.constant 3.200000e+01 : f32
    %309 = vector.broadcast %cst_113 : f32 to vector<16x1xf32>
    %310 = arith.divf %308, %309 : vector<16x1xf32>
    %311 = vector.broadcast %303 : vector<16x1xf32> to vector<16x32xf32>
    %312 = arith.subf %299, %311 : vector<16x32xf32>
    %cst_114 = arith.constant 9.99999996E-13 : f32
    %313 = vector.broadcast %cst_114 : f32 to vector<16x1xf32>
    %314 = arith.addf %310, %313 : vector<16x1xf32>
    %315 = math.rsqrt %314 : vector<16x1xf32>
    %316 = vector.broadcast %315 : vector<16x1xf32> to vector<16x32xf32>
    %317 = arith.mulf %312, %316 : vector<16x32xf32>
    %318 = vector.broadcast %190 : vector<1x32xf32> to vector<16x32xf32>
    %319 = arith.mulf %317, %318 : vector<16x32xf32>
    %320 = vector.broadcast %191 : vector<1x32xf32> to vector<16x32xf32>
    %321 = arith.addf %319, %320 : vector<16x32xf32>
    %322 = arith.truncf %321 : vector<16x32xf32> to vector<16x32xbf16>
    %c2 = arith.constant 2 : index
    %c0_115 = arith.constant 0 : index
    %c0_116 = arith.constant 0 : index
    %323 = vector.load %arg5[%c2, %c0_115, %c0_116] : memref<3x32x32xbf16, #tpu.memory_space<vmem>>, vector<1x32x32xbf16>
    %324 = vector.shape_cast %323 : vector<1x32x32xbf16> to vector<32x32xbf16>
    %cst_117 = arith.constant dense<0.000000e+00> : vector<16x32xf32>
    %325 = tpu.matmul %322, %324, %cst_117 {dimension_numbers = #tpu.dot_dimension_numbers<[1], [0], [0], [1], [0, 0, 1, 1], [], []>} : vector<16x32xbf16>, vector<32x32xbf16>, vector<16x32xf32> -> vector<16x32xf32>
    %c2_118 = arith.constant 2 : index
    %c0_119 = arith.constant 0 : index
    %326 = vector.load %arg3[%c2_118, %c0_119] : memref<19x96xf32, #tpu.memory_space<vmem>>, vector<1x32xf32>
    %327 = vector.broadcast %326 : vector<1x32xf32> to vector<16x32xf32>
    %328 = arith.addf %325, %327 : vector<16x32xf32>
    %329 = math.tanh %328 : vector<16x32xf32>
    %330 = vector.extract_strided_slice %329 {offsets = [0, 0], sizes = [1, 32], strides = [1, 1]} : vector<16x32xf32> to vector<1x32xf32>
    %c0_120 = arith.constant 0 : index
    %c0_121 = arith.constant 0 : index
    %331 = vector.load %arg8[%c0_120, %c0_121] : memref<2x32xf32, #tpu.memory_space<vmem>>, vector<1x32xf32>
    tpu.vector_store %arg8[%c0_120, %c0_121], %330 {strides = array<i32>} : memref<2x32xf32, #tpu.memory_space<vmem>>, vector<1x32xf32>,
    %332 = vector.extract_strided_slice %329 {offsets = [8, 0], sizes = [1, 32], strides = [1, 1]} : vector<16x32xf32> to vector<1x32xf32>
    %c1_122 = arith.constant 1 : index
    %c0_123 = arith.constant 0 : index
    %333 = vector.load %arg8[%c1_122, %c0_123] : memref<2x32xf32, #tpu.memory_space<vmem>>, vector<1x32xf32>
    tpu.vector_store %arg8[%c1_122, %c0_123], %332 {strides = array<i32>} : memref<2x32xf32, #tpu.memory_space<vmem>>, vector<1x32xf32>,
    return
  }
}

</mosaic_0001>

<bundles_post_ra>
// kernel: squeeze.3
= control target key start
LH: loop header
LB: loop body
LE: loop exit
PB: predicated region body
PF: predicated region fallthrough
CT: control target
= control target key end

     0   :  { %vm7_vm0 = vcmask 64512   ;;  %vm13_vm1 = vcmask 130112   ;;  %s39_s0 = inlined_call_operand.vmem [shape: s32[2,8,1], index: 0, kind: input, shape index: {}]   ;;  %s40_s1 = inlined_call_operand.vmem [shape: s32[16,1], index: 1, kind: output, shape index: {}]  }
   0x1   :  { %v4_v0 = vld [vmem:[%s39_s0] sm:$0x3]  ;;  %s22_s0 = smov 8  }
   0x2   :  { %5 = vst [vmem:[#allocation1] sm:$0x3] %v4_v0 }
   0x9   :  { %v10_v1 = vld [vmem:[#allocation1 + $0x1] sm:$0x1]   ;;  %v6_v2 = vld [vmem:[#allocation1] sm:$0x1]  }
   0xa   :  { %11 = vrot.lane.b32.xlu0 %v10_v1, %s22_s0  ;;  %8 = vst.msk [vmem:[#allocation0] sm:$0x1] %vm7_vm0, %v6_v2  }
  0x7c   :  { %v12_v3 = vpop.permute.xlu0 %11  }
  0x7d   :  { %14 = vst.msk [vmem:[#allocation0] sm:$0x1] %vm13_vm1, %v12_v3  }
  0x84   :  { %v18_v4 = vld [vmem:[#allocation0] sm:$0x1] }
  0x85   :  { %20 = vst [vmem:[%s40_s1] sm:$0x1] %v18_v4 }

// kernel: bert_feature_wrapper_forward.1
= control target key start
LH: loop header
LB: loop body
LE: loop exit
PB: predicated region body
PF: predicated region fallthrough
CT: control target
= control target key end

     0   :  { %v2069_v3 = vmov 0   ;;  %v2070_v4 = vmov 1   ;;  %v2071_v6 = vmov 0.0   ;;  %vm107_vm0 = vcmask 1041408   ;;  %s2476_s0 = inlined_call_operand.vmem [shape: s32[16,2], index: 0, kind: input, shape index: {}]   ;;  %s2477_s1 = inlined_call_operand.vmem [shape: f32[16,16], index: 1, kind: input, shape index: {}]   ;;  %s2478_s2 = inlined_call_operand.vmem [shape: bf16[68,32], index: 2, kind: input, shape index: {}]   ;;  %s2479_s3 = inlined_call_operand.vmem [shape: f32[19,96], index: 3, kind: input, shape index: {}]   ;;  %s2480_s4 = inlined_call_operand.vmem [shape: bf16[2,32,96], index: 4, kind: input, shape index: {}]   ;;  %s2481_s5 = inlined_call_operand.vmem [shape: bf16[3,32,32], index: 5, kind: input, shape index: {}]   ;;  %s2482_s6 = inlined_call_operand.vmem [shape: bf16[2,32,64], index: 6, kind: input, shape index: {}]   ;;  %s2483_s7 = inlined_call_operand.vmem [shape: bf16[2,64,32], index: 7, kind: input, shape index: {}]   ;;  %s2484_s8 = inlined_call_operand.hbm [shape: f32[2,32], index: 8, kind: output, shape index: {}]  }
   0x1   :  { %v31_v0 = vld [vmem:[%s2476_s0] sm:$0xff]  ;;  %v32_v1 = vld [vmem:[%s2476_s0 + $0x8] sm:$0xff]  ;;  %1951 = vset.pattern.permute.xlu0 %v2069_v3  ;;  %1952 = vset.pattern.permute.xlu1 %v2070_v4  ;;  %v1956_v10 = vld [vmem:[%s2478_s2 + $0x10] sm:$0xff]   ;;  %vm2072_vm1 = vmmov 0  }
   0x2   :  { %v1954_v2 = vld [vmem:[%s2478_s2] sm:$0xff]   ;;  %v52_v5 = vadd.s32 66, %v31_v0  ;;  %39 = vperm.xlu0 %1951, %v31_v0   ;;  %1791 = vmatprep.subr.bf16.mxu0 %v2071_v6  ;;  %v53_v7 = vadd.s32 66, %v32_v1  ;;  %v1955_v8 = vld [vmem:[%s2478_s2 + $0x8] sm:$0xff]   ;;  %v1957_v11 = vld [vmem:[%s2478_s2 + $0x18] sm:$0xff]  }
   0x3   :  { %1792 = vmatpush3.bf16.msra.mxu0 %v1954_v2  ;;  %1805 = vmatprep.subr.bf16.mxu1 %v2071_v6  ;;  %v1958_v9 = vld [vmem:[%s2478_s2 + $0x20] ss:$0 sps:$4 sm:$0x33]  }
   0x4   :  { %55 = vperm.xlu1 %1952, %v52_v5   ;;  %1793 = vmatprep.subr.bf16.mxu0 %v2071_v6  ;;  %v109_v12 = vsel %vm107_vm0, %v1958_v9, 0 }
   0x5   :  { %1801 = vmatprep.mubr.msk.bf16.mxu0 %vm2072_vm1, %v2071_v6  ;;  %1809 = vmatprep.mubr.msk.bf16.mxu1 %vm2072_vm1, %v2071_v6 }
   0x6   :  { %42 = vperm.xlu0 %1951, %v32_v1  }
   0x7   :  { %1794 = vmatpush3.bf16.msra.mxu0 %v1955_v8 }
   0x8   :  { %58 = vperm.xlu1 %1952, %v53_v7   ;;  %1795 = vmatprep.subr.bf16.mxu0 %v2071_v6 }
   0xa   :  { %1953 = vset.pattern.permute.xlu0 %v2070_v4 }
   0xb   :  { %1796 = vmatpush3.bf16.msra.mxu0 %v1956_v10 }
   0xc   :  { %1797 = vmatprep.subr.bf16.mxu0 %v2071_v6 }
   0xf   :  { %1798 = vmatpush3.bf16.msra.mxu0 %v1957_v11 }
  0x10   :  { %1799 = vmatprep.subr.bf16.mxu0 %v2071_v6 }
  0x13   :  { %1800 = vmatpush3.bf16.msra.mxu0 %v109_v12 }
  0x14   :  { %1825 = vmatprep.subr.bf16.mxu0 %v2071_v6 }
  0x15   :  { %13 = vsyncpa [#allocation3], 0  ;;  %v33_v13 = vlaneseq  ;;  %vm103_vm12 = vcmask 556032   ;;  %vm154_vm13 = vcmask 261120   ;;  %v1959_v42 = vld [vmem:[%s2480_s4] sm:$0xff]   ;;  %v1960_v43 = vld [vmem:[%s2480_s4 + $0x8] sm:$0xff]  }
  0x16   :  { %1806 = vmatpush3.bf16.msra.mxu1 %v1959_v42  ;;  %v1652_v52 = vld [vmem:[%s2479_s3] ss:$0 sm:$0xff]  ;;  %v1653_v56 = vld [vmem:[%s2479_s3 + $0x1] ss:$0 sm:$0xff]  ;;  %v1654_v61 = vld [vmem:[%s2479_s3 + $0x3] ss:$0 sm:$0xff] }
  0x17   :  { %v36_v14 = vshrl.u32 %v33_v13, 7  ;;  %v34_v15 = vand.u32 127, %v33_v13  ;;  %1807 = vmatprep.subr.bf16.mxu1 %v2071_v6  ;;  %s2073_s27 = smov 80   ;;  %s2074_s28 = smov 96   ;;  %vm289_vm14 = vcmask 130048   ;;  %v2212_v13 = vld [vmem:[%s2477_s1] sm:$0xff] }
  0x18   :  { %s2075_s29 = smov 112   ;;  %s2077_s12 = smov 64   ;;  %vm792_vm15 = vcmask 523264   ;;  %vm1629_vm0 = vcmask 253952  }
  0x19   :  { %v46_v16 = vadd.s32 50, %v36_v14  ;;  %v37_v17 = vadd.s32 8, %v36_v14  ;;  %s2078_s9 = smov [#allocation2]  }
  0x1a   :  { %1808 = vmatpush3.bf16.msra.mxu1 %v1960_v43  ;;  %s1638_s10 = sshll.u32 %s2078_s9, 4  ;;  %s1639_s10 = int_to_ptr.vmem [resolvable:$true] %s1638_s10 }
  0x1b   :  { %vm48_vm2 = vcmp.eq.s32.totalorder %v34_v15, %v46_v16  ;;  %v47_v18 = vadd.s32 50, %v37_v17  ;;  %1813 = vmatprep.subr.bf16.mxu1 %v2071_v6  ;;  %s2045_s11 = scalar_lea.vmem %s1639_s10, 32  ;;  %p2050_p1 = scmp.lt.s32.totalorder %s1639_s10, %s1639_s10 }
  0x1c   :  { %p2046_p0 = scmp.ne.s32.totalorder %s1639_s10, %s2045_s11  ;;  %p2051_p2 = scmp.lt.s32.totalorder %s2045_s11, %s2045_s11 }
  0x1d   :  { %vm49_vm6 = vcmp.eq.s32.totalorder %v34_v15, %v47_v18 }
  0x1e   :  { %p2052_p3 = por %p2051_p2, %p2050_p1 }
  0x20   :  { %p2053_p4 = pnand %p2052_p3, %p2046_p0 }
  0x81   :  { %v40_v19 = vpop.permute.xlu0 %39 }
  0x82   :  { %vm44_vm3 = vcmp.eq.s32.totalorder %v34_v15, %v40_v19  ;;  %v2217_v19 = vld [vmem:[%s2477_s1 + $0x8] sm:$0xff]  ;;  %s2076_s1 = smov 48  }
  0x83   :  { %v56_v20 = vpop.permute.xlu1 %55  ;;  %vm50_vm4 = vmor %vm44_vm3, %vm48_vm2 }
  0x84   :  { %vm60_vm5 = vcmp.eq.s32.totalorder %v34_v15, %v56_v20 }
  0x85   :  { %v43_v21 = vpop.permute.xlu0 %42  ;;  %vm62_vm7 = vmor %vm50_vm4, %vm60_vm5 }
  0x86   :  { %vm45_vm8 = vcmp.eq.s32.totalorder %v34_v15, %v43_v21  ;;  %v64_v23 = vsel %vm62_vm7, 1.0, %v2071_v6 }
  0x87   :  { %v59_v22 = vpop.permute.xlu1 %58  ;;  %vm51_vm9 = vmor %vm45_vm8, %vm49_vm6 }
  0x88   :  { %vm61_vm10 = vcmp.eq.s32.totalorder %v34_v15, %v59_v22 }
  0x89   :  { %vm63_vm11 = vmor %vm51_vm9, %vm61_vm10 }
  0x8a   :  { %v65_v24 = vsel %vm63_vm11, 1.0, %v2071_v6 }
  0x8b   :  { %v66_v25 = vpack.c.bf16 %v65_v24, %v64_v23 }
  0x8d   :  { %1802 = vmatmul.mubr.msk.bf16.vlgmr.msra.gmra.mrb[0].mxu0 %vm103_vm12, %v66_v25 }
  0x8e   :  { %1827 = vmatprep.mubr.msk.bf16.mxu0 %vm2072_vm1, %v2071_v6 }
 0x160   :  { %v145_v26 = vpop.f32.mrb[0].mxu0 }
 0x161   :  { %v1803_v27 = vpop.f32.mrb[1].mxu0  ;;  %v155_v28 = vsel %vm154_vm13, %v145_v26, 0.0 }
 0x162   :  { %156 = vadd.xlane.f32.xlu0 %v155_v28  ;;  %v148_v29 = vpop.f32.mrb[2].mxu0 }
 0x163   :  { %v1804_v30 = vpop.f32.mrb[3].mxu0  ;;  %v158_v31 = vsel %vm154_vm13, %v148_v29, 0.0 }
 0x164   :  { %159 = vadd.xlane.f32.xlu1 %v158_v31 }
 0x1ef   :  { %v157_v32 = vpop.xlane.xlu0 %156 }
 0x1f0   :  { %v162_v33 = vmul.f32 0.03125, %v157_v32 }
 0x1f1   :  { %v160_v34 = vpop.xlane.xlu1 %159 }
 0x1f2   :  { %v164_v35 = vsub.f32 %v145_v26, %v162_v33  ;;  %v163_v36 = vmul.f32 0.03125, %v160_v34 }
 0x1f4   :  { %v165_v37 = vsub.f32 %v148_v29, %v163_v36  ;;  %v166_v38 = vmul.f32 %v164_v35, %v164_v35 }
 0x1f6   :  { %v168_v39 = vsel %vm154_vm13, %v166_v38, 0.0  ;;  %v167_v40 = vmul.f32 %v165_v37, %v165_v37 }
 0x1f7   :  { %169 = vadd.xlane.f32.xlu0 %v168_v39 }
 0x1f8   :  { %v171_v41 = vsel %vm154_vm13, %v167_v40, 0.0 }
 0x1fb   :  { %172 = vadd.xlane.f32.xlu0 %v171_v41 }
 0x284   :  { %v170_v44 = vpop.xlane.xlu0 %169 }
 0x285   :  { %v174_v45 = vmul.f32 0.03125, %v170_v44 }
 0x287   :  { %v176_v46 = vadd.f32 1e-12, %v174_v45 }
 0x288   :  { %v173_v47 = vpop.xlane.xlu0 %172 }
 0x289   :  { %1981 = vrsqrt.f32 %v176_v46  ;;  %v175_v48 = vmul.f32 0.03125, %v173_v47 }
 0x28b   :  { %v177_v49 = vadd.f32 1e-12, %v175_v48 }
 0x28d   :  { %1983 = vrsqrt.f32 %v177_v49 }
 0x293   :  { %v1982_v50 = vpop.eup %1981 }
 0x294   :  { %v180_v51 = vmul.f32 %v1982_v50, %v164_v35 }
 0x296   :  { %v186_v55 = vmul.f32 %v1652_v52, %v180_v51 }
 0x297   :  { %v1984_v53 = vpop.eup %1983 }
 0x298   :  { %v181_v54 = vmul.f32 %v1984_v53, %v165_v37  ;;  %v2178_v58 = vadd.f32 %v1653_v56, %v186_v55 }
 0x29a   :  { %v187_v57 = vmul.f32 %v1652_v52, %v181_v54 }
 0x29c   :  { %v2180_v59 = vadd.f32 %v1653_v56, %v187_v57 }
 0x29e   :  { %v224_v60 = vpack.c.bf16 %v2180_v59, %v2178_v58 }
 0x2a0   :  { %1810 = vmatmul.mubr.msk.bf16.vlgmr.msra.gmra.mrb[0].mxu1 %vm154_vm13, %v224_v60 }
 0x2a1   :  { %1815 = vmatprep.mubr.msk.bf16.mxu1 %vm2072_vm1, %v2071_v6 }
 0x373   :  { %v278_v62 = vpop.f32.mrb[0].mxu1 }
 0x374   :  { %v1811_v63 = vpop.f32.mrb[1].mxu1  ;;  %v279_v1 = vadd.f32 %v1654_v61, %v278_v62 }
 0x375   :  { %v281_v0 = vpop.f32.mrb[2].mxu1 }
 0x376   :  { %v282_v2 = vadd.f32 %v1654_v61, %v281_v0  ;;  %v1812_v3 = vpop.f32.mrb[3].mxu1 }
 0x378   :  { %v2190_v4 = vpack.c.bf16 %v282_v2, %v279_v1 }
 0x37a   :  { %414 = vrot.lane.b32.xlu0 %v2190_v4, %s2073_s27  ;;  %287 = vrot.lane.b32.xlu1 %v2190_v4, %s2074_s28 }
 0x37e   :  { %412 = vrot.lane.b32.xlu1 %v2190_v4, %s2075_s29 }
 0x3ec   :  { %v415_v5 = vpop.permute.xlu0 %414  ;;  %v288_v7 = vpop.permute.xlu1 %287 }
 0x3ed   :  { %v420_v8 = vsel %vm289_vm14, %v415_v5, 0  ;;  %v294_v9 = vsel %vm289_vm14, %v288_v7, 0 }
 0x3ee   :  { %1814 = vmatpush3.bf16.xpose.msra.mxu1 %v294_v9  ;;  %1826 = vmatpush3.bf16.xpose.msra.mxu0 %v420_v8  ;;  %v1961_v8 = vld [vmem:[%s2481_s5] sm:$0xff]   ;;  %v1962_v9 = vld [vmem:[%s2481_s5 + $0x8] sm:$0xff]  }
 0x3ef   :  { %1819 = vmatprep.subr.bf16.mxu1 %v2071_v6  ;;  %1837 = vmatprep.subr.bf16.mxu0 %v2071_v6 }
 0x3f0   :  { %v413_v10 = vpop.permute.xlu1 %412 }
 0x3f5   :  { %1816 = vmatmul.mubr.msk.bf16.vlgmr.msra.gmra.mrb[4].mxu1 %vm289_vm14, %v2190_v4  ;;  %1828 = vmatmul.mubr.msk.bf16.vlgmr.msra.gmra.mrb[4].mxu0 %vm289_vm14, %v413_v10 }
 0x3f6   :  { %1821 = vmatprep.mubr.msk.bf16.mxu1 %vm2072_vm1, %v2071_v6  ;;  %1839 = vmatprep.mubr.msk.bf16.mxu0 %vm2072_vm1, %v2071_v6 }
 0x3f7   :  { %1838 = vmatpush3.bf16.msra.mxu0 %v1962_v9  ;;  %v1669_v9 = vld [vmem:[%s2479_s3 + $0x7] ss:$0 sm:$0xff] }
 0x3f8   :  { %1849 = vmatprep.subr.bf16.mxu0 %v2071_v6 }
 0x4c8   :  { %v330_v11 = vpop.f32.mrb[4].mxu1  ;;  %v456_v12 = vpop.f32.mrb[4].mxu0 }
 0x4c9   :  { %v337_v14 = vmul.f32 0.25, %v330_v11  ;;  %v1817_v15 = vpop.f32.mrb[5].mxu1  ;;  %v1829_v16 = vpop.f32.mrb[5].mxu0  ;;  %v463_v20 = vmul.f32 0.25, %v456_v12 }
 0x4ca   :  { %v333_v17 = vpop.f32.mrb[6].mxu1  ;;  %v459_v18 = vpop.f32.mrb[6].mxu0 }
 0x4cb   :  { %v338_v21 = vmul.f32 0.25, %v333_v17  ;;  %v464_v22 = vmul.f32 0.25, %v459_v18  ;;  %v1818_v23 = vpop.f32.mrb[7].mxu1  ;;  %v1830_v24 = vpop.f32.mrb[7].mxu0  ;;  %v339_v25 = vadd.f32 %v337_v14, %v2212_v13  ;;  %v465_v30 = vadd.f32 %v463_v20, %v2212_v13 }
 0x4cd   :  { %v341_v26 = vsel %vm289_vm14, %v339_v25, -inf  ;;  %v340_v27 = vadd.f32 %v338_v21, %v2217_v19  ;;  %v466_v28 = vadd.f32 %v464_v22, %v2217_v19  ;;  %v467_v32 = vsel %vm289_vm14, %v465_v30, -inf }
 0x4ce   :  { %342 = vmax.xlane.f32.xlu1 %v341_v26  ;;  %v1666_v26 = vld [vmem:[%s2479_s3 + $0x4] ss:$0 sm:$0xff] }
 0x4cf   :  { %v344_v29 = vsel %vm289_vm14, %v340_v27, -inf  ;;  %v470_v31 = vsel %vm289_vm14, %v466_v28, -inf }
 0x4d0   :  { %345 = vmax.xlane.f32.xlu0 %v344_v29 }
 0x4d2   :  { %471 = vmax.xlane.f32.xlu1 %v470_v31 }
 0x4d4   :  { %468 = vmax.xlane.f32.xlu0 %v467_v32 }
 0x55b   :  { %v343_v33 = vpop.xlane.xlu1 %342 }
 0x55c   :  { %v347_v34 = vsub.f32 %v339_v25, %v343_v33 }
 0x55d   :  { %v346_v35 = vpop.xlane.xlu0 %345 }
 0x55e   :  { %v349_v36 = vmul.f32 1.442695, %v347_v34  ;;  %v348_v37 = vsub.f32 %v340_v27, %v346_v35 }
 0x55f   :  { %v472_v38 = vpop.xlane.xlu1 %471 }
 0x560   :  { %1985 = vpow2.f32 %v349_v36  ;;  %v351_v39 = vmul.f32 1.442695, %v348_v37  ;;  %v474_v40 = vsub.f32 %v466_v28, %v472_v38 }
 0x561   :  { %v469_v41 = vpop.xlane.xlu0 %468 }
 0x562   :  { %1987 = vpow2.f32 %v351_v39  ;;  %v477_v42 = vmul.f32 1.442695, %v474_v40  ;;  %v473_v43 = vsub.f32 %v465_v30, %v469_v41 }
 0x564   :  { %1989 = vpow2.f32 %v477_v42  ;;  %v475_v44 = vmul.f32 1.442695, %v473_v43 }
 0x566   :  { %1991 = vpow2.f32 %v475_v44 }
 0x56a   :  { %v1986_v45 = vpop.eup %1985 }
 0x56b   :  { %v353_v46 = vsel %vm289_vm14, %v1986_v45, 0.0 }
 0x56c   :  { %v1988_v47 = vpop.eup %1987  ;;  %354 = vadd.xlane.f32.xlu0 %v353_v46 }
 0x56d   :  { %v356_v48 = vsel %vm289_vm14, %v1988_v47, 0.0 }
 0x56e   :  { %v1990_v49 = vpop.eup %1989  ;;  %357 = vadd.xlane.f32.xlu1 %v356_v48  ;;  %v1964_v48 = vld [vmem:[%s2482_s6 + $0x8] sm:$0xff]  }
 0x56f   :  { %v482_v52 = vsel %vm289_vm14, %v1990_v49, 0.0 }
 0x570   :  { %v1992_v50 = vpop.eup %1991 }
 0x571   :  { %v479_v51 = vsel %vm289_vm14, %v1992_v50, 0.0 }
 0x572   :  { %480 = vadd.xlane.f32.xlu0 %v479_v51  ;;  %483 = vadd.xlane.f32.xlu1 %v482_v52 }
 0x583   :  { %490 = vrot.lane.b32.xlu1 %v2190_v4, %s2076_s1 }
 0x588   :  { %364 = vrot.lane.b32.xlu0 %v2190_v4, %s2077_s12 }
 0x5f9   :  { %v355_v53 = vpop.xlane.xlu0 %354 }
 0x5fa   :  { %1993 = vrcp.f32 %v355_v53 }
 0x5fb   :  { %v358_v54 = vpop.xlane.xlu1 %357 }
 0x5fc   :  { %1995 = vrcp.f32 %v358_v54 }
 0x5ff   :  { %v481_v55 = vpop.xlane.xlu0 %480  ;;  %v484_v56 = vpop.xlane.xlu1 %483 }
 0x600   :  { %1997 = vrcp.f32 %v481_v55 }
 0x601   :  { %1999 = vrcp.f32 %v484_v56  ;;  %v1667_v56 = vld [vmem:[%s2479_s3 + $0x5] ss:$0 sm:$0xff] }
 0x603   :  { %v365_v57 = vpop.permute.xlu0 %364  ;;  %v491_v3 = vpop.permute.xlu1 %490 }
 0x604   :  { %v1994_v60 = vpop.eup %1993  ;;  %1820 = vmatpush3.bf16.msra.mxu1 %v365_v57 }
 0x605   :  { %1831 = vmatprep.subr.bf16.mxu1 %v2071_v6  ;;  %v360_v62 = vmul.f32 %v1994_v60, %v1986_v45 }
 0x606   :  { %v1996_v61 = vpop.eup %1995 }
 0x607   :  { %v362_v63 = vmul.f32 %v1996_v61, %v1988_v47 }
 0x609   :  { %v363_v0 = vpack.c.bf16 %v362_v63, %v360_v62  ;;  %v1668_v63 = vld [vmem:[%s2479_s3 + $0x6] ss:$0 sm:$0xff] }
 0x60a   :  { %v1998_v1 = vpop.eup %1997 }
 0x60b   :  { %v2000_v2 = vpop.eup %1999  ;;  %1822 = vmatmul.mubr.msk.bf16.vlgmr.msra.gmra.mrb[8].mxu1 %vm289_vm14, %v363_v0  ;;  %v486_v4 = vmul.f32 %v1998_v1, %v1992_v50 }
 0x60c   :  { %1832 = vmatpush3.bf16.msra.mxu1 %v491_v3  ;;  %1833 = vmatprep.mubr.msk.bf16.mxu1 %vm2072_vm1, %v2071_v6  ;;  %v488_v5 = vmul.f32 %v2000_v2, %v1990_v49 }
 0x60d   :  { %1843 = vmatprep.subr.bf16.mxu1 %v2071_v6 }
 0x60e   :  { %v489_v7 = vpack.c.bf16 %v488_v5, %v486_v4  ;;  %v1965_v4 = vld [vmem:[%s2483_s7] sm:$0xff]   ;;  %v1966_v5 = vld [vmem:[%s2483_s7 + $0x8] sm:$0xff]  }
 0x613   :  { %1834 = vmatmul.mubr.msk.bf16.vlgmr.msra.gmra.mrb[12].mxu1 %vm289_vm14, %v489_v7  ;;  %v1967_v7 = vld [vmem:[%s2483_s7 + $0x10] sm:$0xff]  }
 0x614   :  { %1845 = vmatprep.mubr.msk.bf16.mxu1 %vm2072_vm1, %v2071_v6  ;;  %1844 = vmatpush3.bf16.msra.mxu1 %v1961_v8  ;;  %v1968_v8 = vld [vmem:[%s2483_s7 + $0x18] sm:$0xff]  }
 0x615   :  { %1857 = vmatprep.subr.bf16.mxu1 %v2071_v6 }
 0x6de   :  { %v404_v10 = vpop.f32.mrb[8].mxu1 }
 0x6df   :  { %v1823_v11 = vpop.f32.mrb[9].mxu1 }
 0x6e0   :  { %v407_v12 = vpop.f32.mrb[10].mxu1 }
 0x6e1   :  { %v411_v14 = vpack.c.bf16 %v407_v12, %v404_v10  ;;  %v1824_v15 = vpop.f32.mrb[11].mxu1 }
 0x6e3   :  { %1846 = vmatmul.mubr.msk.bf16.vlgmr.msra.gmra.mrb[16].mxu1 %vm289_vm14, %v411_v14 }
 0x6e4   :  { %1865 = vmatprep.mubr.msk.bf16.mxu1 %vm2072_vm1, %v2071_v6  ;;  %1858 = vmatpush3.bf16.msra.mxu1 %v1965_v4 }
 0x6e5   :  { %1859 = vmatprep.subr.bf16.mxu1 %v2071_v6 }
 0x6e6   :  { %v530_v16 = vpop.f32.mrb[12].mxu1 }
 0x6e7   :  { %v1835_v17 = vpop.f32.mrb[13].mxu1 }
 0x6e8   :  { %v533_v18 = vpop.f32.mrb[14].mxu1  ;;  %1860 = vmatpush3.bf16.msra.mxu1 %v1966_v5 }
 0x6e9   :  { %v537_v20 = vpack.c.bf16 %v533_v18, %v530_v16  ;;  %v1836_v21 = vpop.f32.mrb[15].mxu1  ;;  %1861 = vmatprep.subr.bf16.mxu1 %v2071_v6 }
 0x6eb   :  { %1840 = vmatmul.mubr.msk.bf16.vlgmr.msra.gmra.mrb[8].mxu0 %vm289_vm14, %v537_v20 }
 0x6ec   :  { %1853 = vmatprep.mubr.msk.bf16.mxu0 %vm2072_vm1, %v2071_v6  ;;  %1862 = vmatpush3.bf16.msra.mxu1 %v1967_v7 }
 0x6ed   :  { %1863 = vmatprep.subr.bf16.mxu1 %v2071_v6 }
 0x6f0   :  { %1864 = vmatpush3.bf16.msra.mxu1 %v1968_v8 }
 0x6f1   :  { %1883 = vmatprep.subr.bf16.mxu1 %v2071_v6 }
 0x7b6   :  { %v631_v22 = vpop.f32.mrb[16].mxu1 }
 0x7b7   :  { %v1847_v23 = vpop.f32.mrb[17].mxu1 }
 0x7b8   :  { %v634_v24 = vpop.f32.mrb[18].mxu1 }
 0x7b9   :  { %v1848_v25 = vpop.f32.mrb[19].mxu1 }
 0x7be   :  { %v581_v27 = vpop.f32.mrb[8].mxu0 }
 0x7bf   :  { %v632_v28 = vadd.f32 %v631_v22, %v581_v27  ;;  %v1841_v29 = vpop.f32.mrb[9].mxu0 }
 0x7c0   :  { %v584_v30 = vpop.f32.mrb[10].mxu0 }
 0x7c1   :  { %v642_v31 = vadd.f32 %v1666_v26, %v632_v28  ;;  %v635_v32 = vadd.f32 %v634_v24, %v584_v30  ;;  %v1842_v33 = vpop.f32.mrb[11].mxu0 }
 0x7c3   :  { %v643_v34 = vadd.f32 %v1666_v26, %v635_v32  ;;  %v644_v35 = vadd.f32 %v642_v31, %v2178_v58 }
 0x7c5   :  { %v646_v36 = vsel %vm154_vm13, %v644_v35, 0.0  ;;  %v645_v37 = vadd.f32 %v643_v34, %v2180_v59  ;;  %v1963_v59 = vld [vmem:[%s2482_s6] sm:$0xff]  }
 0x7c6   :  { %647 = vadd.xlane.f32.xlu1 %v646_v36  ;;  %1850 = vmatpush3.bf16.msra.mxu0 %v1963_v59 }
 0x7c7   :  { %v649_v38 = vsel %vm154_vm13, %v645_v37, 0.0  ;;  %1851 = vmatprep.subr.bf16.mxu0 %v2071_v6 }
 0x7c8   :  { %650 = vadd.xlane.f32.xlu0 %v649_v38 }
 0x7ca   :  { %1852 = vmatpush3.bf16.msra.mxu0 %v1964_v48 }
 0x7cb   :  { %1869 = vmatprep.subr.bf16.mxu0 %v2071_v6 }
 0x853   :  { %v648_v39 = vpop.xlane.xlu1 %647 }
 0x854   :  { %v652_v40 = vmul.f32 0.03125, %v648_v39 }
 0x855   :  { %v651_v41 = vpop.xlane.xlu0 %650 }
 0x856   :  { %v654_v42 = vsub.f32 %v644_v35, %v652_v40  ;;  %v653_v43 = vmul.f32 0.03125, %v651_v41 }
 0x858   :  { %v655_v44 = vsub.f32 %v645_v37, %v653_v43  ;;  %v656_v45 = vmul.f32 %v654_v42, %v654_v42  ;;  %v1673_v37 = vld [vmem:[%s2479_s3 + $0x8] ss:$0 sm:$0xff] }
 0x85a   :  { %v658_v46 = vsel %vm154_vm13, %v656_v45, 0.0  ;;  %v657_v47 = vmul.f32 %v655_v44, %v655_v44 }
 0x85b   :  { %659 = vadd.xlane.f32.xlu0 %v658_v46 }
 0x85c   :  { %v661_v58 = vsel %vm154_vm13, %v657_v47, 0.0 }
 0x85d   :  { %662 = vadd.xlane.f32.xlu1 %v661_v58 }
 0x8e8   :  { %v660_v49 = vpop.xlane.xlu0 %659 }
 0x8e9   :  { %v664_v50 = vmul.f32 0.03125, %v660_v49 }
 0x8ea   :  { %v663_v51 = vpop.xlane.xlu1 %662 }
 0x8eb   :  { %v666_v52 = vadd.f32 1e-12, %v664_v50  ;;  %v665_v53 = vmul.f32 0.03125, %v663_v51 }
 0x8ed   :  { %2001 = vrsqrt.f32 %v666_v52  ;;  %v667_v54 = vadd.f32 1e-12, %v665_v53 }
 0x8ef   :  { %2003 = vrsqrt.f32 %v667_v54 }
 0x8f7   :  { %v2002_v55 = vpop.eup %2001 }
 0x8f8   :  { %v670_v57 = vmul.f32 %v2002_v55, %v654_v42 }
 0x8f9   :  { %v2004_v60 = vpop.eup %2003 }
 0x8fa   :  { %v676_v61 = vmul.f32 %v1667_v56, %v670_v57  ;;  %v671_v62 = vmul.f32 %v2004_v60, %v655_v44  ;;  %v1970_v57 = vld [vmem:[%s2480_s4 + $0x18] sm:$0xff]  }
 0x8fc   :  { %v677_v0 = vmul.f32 %v1667_v56, %v671_v62  ;;  %v682_v1 = vadd.f32 %v1668_v63, %v676_v61  ;;  %v1969_v56 = vld [vmem:[%s2480_s4 + $0x10] sm:$0xff]  }
 0x8fe   :  { %v683_v2 = vadd.f32 %v1668_v63, %v677_v0 }
 0x900   :  { %v684_v3 = vpack.c.bf16 %v683_v2, %v682_v1 }
 0x902   :  { %1854 = vmatmul.mubr.msk.bf16.vlgmr.msra.gmra.mrb[12].mxu0 %vm154_vm13, %v684_v3  ;;  %v1679_v3 = vld [vmem:[%s2479_s3 + $0x9] ss:$0 sm:$0xff] }
 0x903   :  { %1873 = vmatprep.mubr.msk.bf16.mxu0 %vm2072_vm1, %v2071_v6  ;;  %1870 = vmatpush3.bf16.msra.mxu0 %v1969_v56 }
 0x904   :  { %1871 = vmatprep.subr.bf16.mxu0 %v2071_v6 }
 0x907   :  { %1872 = vmatpush3.bf16.msra.mxu0 %v1970_v57 }
 0x908   :  { %1877 = vmatprep.subr.bf16.mxu0 %v2071_v6 }
 0x9d5   :  { %v738_v10 = vpop.f32.mrb[12].mxu0 }
 0x9d6   :  { %v739_v11 = vadd.f32 %v1669_v9, %v738_v10  ;;  %v1855_v12 = vpop.f32.mrb[13].mxu0 }
 0x9d7   :  { %v741_v14 = vpop.f32.mrb[14].mxu0 }
 0x9d8   :  { %v745_v15 = vmul.f32 %v739_v11, %v739_v11  ;;  %v742_v16 = vadd.f32 %v1669_v9, %v741_v14  ;;  %v1856_v17 = vpop.f32.mrb[15].mxu0  ;;  %v1680_v9 = vld [vmem:[%s2479_s3 + $0xa] ss:$0 sm:$0xff] }
 0x9da   :  { %v747_v18 = vmul.f32 %v745_v15, %v739_v11  ;;  %v746_v20 = vmul.f32 %v742_v16, %v742_v16  ;;  %v1701_v15 = vld [vmem:[%s2479_s3 + $0xb] ss:$0 sm:$0xff] }
 0x9dc   :  { %v749_v21 = vmul.f32 0.044715, %v747_v18  ;;  %v748_v22 = vmul.f32 %v746_v20, %v742_v16 }
 0x9de   :  { %v751_v23 = vadd.f32 %v749_v21, %v739_v11  ;;  %v750_v24 = vmul.f32 0.044715, %v748_v22 }
 0x9e0   :  { %v753_v25 = vmul.f32 0.7978846, %v751_v23  ;;  %v752_v26 = vadd.f32 %v750_v24, %v742_v16 }
 0x9e2   :  { %2005 = vtanh.f32 %v753_v25  ;;  %v754_v27 = vmul.f32 0.7978846, %v752_v26 }
 0x9e4   :  { %2007 = vtanh.f32 %v754_v27 }
 0x9ec   :  { %v2006_v28 = vpop.eup %2005 }
 0x9ed   :  { %v757_v29 = vadd.f32 1.0, %v2006_v28 }
 0x9ee   :  { %v2008_v30 = vpop.eup %2007 }
 0x9ef   :  { %v759_v31 = vmul.f32 0.5, %v757_v29  ;;  %v758_v32 = vadd.f32 1.0, %v2008_v30 }
 0x9f1   :  { %v760_v33 = vmul.f32 0.5, %v758_v32  ;;  %v761_v34 = vmul.f32 %v759_v31, %v739_v11 }
 0x9f3   :  { %v762_v35 = vmul.f32 %v760_v33, %v742_v16 }
 0x9f5   :  { %v763_v36 = vpack.c.bf16 %v762_v35, %v761_v34 }
 0x9f7   :  { %1866 = vmatmul.mubr.msk.bf16.vlgmr.msra.gmra.mrb[20].mxu1 %vm792_vm15, %v763_v36 }
 0x9f8   :  { %1885 = vmatprep.mubr.msk.bf16.mxu1 %vm2072_vm1, %v2071_v6 }
 0xaca   :  { %v830_v38 = vpop.f32.mrb[20].mxu1 }
 0xacb   :  { %v831_v39 = vadd.f32 %v1673_v37, %v830_v38  ;;  %v1867_v40 = vpop.f32.mrb[21].mxu1 }
 0xacc   :  { %v833_v41 = vpop.f32.mrb[22].mxu1 }
 0xacd   :  { %v834_v42 = vadd.f32 %v1673_v37, %v833_v41  ;;  %v1868_v43 = vpop.f32.mrb[23].mxu1  ;;  %v837_v44 = vadd.f32 %v831_v39, %v682_v1 }
 0xacf   :  { %v839_v45 = vsel %vm154_vm13, %v837_v44, 0.0  ;;  %v838_v46 = vadd.f32 %v834_v42, %v683_v2 }
 0xad0   :  { %840 = vadd.xlane.f32.xlu0 %v839_v45 }
 0xad1   :  { %v842_v47 = vsel %vm154_vm13, %v838_v46, 0.0 }
 0xad2   :  { %843 = vadd.xlane.f32.xlu1 %v842_v47 }
 0xb5d   :  { %v841_v58 = vpop.xlane.xlu0 %840 }
 0xb5e   :  { %v845_v59 = vmul.f32 0.03125, %v841_v58 }
 0xb5f   :  { %v844_v48 = vpop.xlane.xlu1 %843 }
 0xb60   :  { %v847_v49 = vsub.f32 %v837_v44, %v845_v59  ;;  %v846_v50 = vmul.f32 0.03125, %v844_v48 }
 0xb62   :  { %v848_v51 = vsub.f32 %v838_v46, %v846_v50  ;;  %v849_v52 = vmul.f32 %v847_v49, %v847_v49 }
 0xb64   :  { %v851_v53 = vsel %vm154_vm13, %v849_v52, 0.0  ;;  %v850_v54 = vmul.f32 %v848_v51, %v848_v51 }
 0xb65   :  { %852 = vadd.xlane.f32.xlu0 %v851_v53 }
 0xb66   :  { %v854_v55 = vsel %vm154_vm13, %v850_v54, 0.0 }
 0xb67   :  { %855 = vadd.xlane.f32.xlu1 %v854_v55 }
 0xbf2   :  { %v853_v60 = vpop.xlane.xlu0 %852 }
 0xbf3   :  { %v857_v61 = vmul.f32 0.03125, %v853_v60 }
 0xbf4   :  { %v856_v62 = vpop.xlane.xlu1 %855 }
 0xbf5   :  { %v859_v63 = vadd.f32 1e-12, %v857_v61  ;;  %v858_v0 = vmul.f32 0.03125, %v856_v62 }
 0xbf7   :  { %2009 = vrsqrt.f32 %v859_v63  ;;  %v860_v1 = vadd.f32 1e-12, %v858_v0 }
 0xbf9   :  { %2011 = vrsqrt.f32 %v860_v1 }
 0xc01   :  { %v2010_v2 = vpop.eup %2009 }
 0xc02   :  { %v863_v4 = vmul.f32 %v2010_v2, %v847_v49 }
 0xc03   :  { %v2012_v5 = vpop.eup %2011 }
 0xc04   :  { %v869_v7 = vmul.f32 %v1679_v3, %v863_v4  ;;  %v864_v8 = vmul.f32 %v2012_v5, %v848_v51 }
 0xc06   :  { %v870_v10 = vmul.f32 %v1679_v3, %v864_v8  ;;  %v2326_v11 = vadd.f32 %v1680_v9, %v869_v7 }
 0xc08   :  { %v2328_v12 = vadd.f32 %v1680_v9, %v870_v10 }
 0xc0a   :  { %v909_v14 = vpack.c.bf16 %v2328_v12, %v2326_v11 }
 0xc0c   :  { %1874 = vmatmul.mubr.msk.bf16.vlgmr.msra.gmra.mrb[16].mxu0 %vm154_vm13, %v909_v14 }
 0xc0d   :  { %1879 = vmatprep.mubr.msk.bf16.mxu0 %vm2072_vm1, %v2071_v6 }
 0xcdf   :  { %v963_v16 = vpop.f32.mrb[16].mxu0 }
 0xce0   :  { %v1875_v17 = vpop.f32.mrb[17].mxu0  ;;  %v964_v20 = vadd.f32 %v1701_v15, %v963_v16 }
 0xce1   :  { %v966_v18 = vpop.f32.mrb[18].mxu0 }
 0xce2   :  { %v967_v21 = vadd.f32 %v1701_v15, %v966_v18  ;;  %v1876_v22 = vpop.f32.mrb[19].mxu0 }
 0xce4   :  { %v2338_v23 = vpack.c.bf16 %v967_v21, %v964_v20 }
 0xce6   :  { %1098 = vrot.lane.b32.xlu1 %v2338_v23, %s2073_s27  ;;  %972 = vrot.lane.b32.xlu0 %v2338_v23, %s2074_s28 }
 0xcea   :  { %1096 = vrot.lane.b32.xlu1 %v2338_v23, %s2075_s29 }
 0xd58   :  { %v973_v24 = vpop.permute.xlu0 %972  ;;  %v1099_v26 = vpop.permute.xlu1 %1098 }
 0xd59   :  { %v978_v25 = vsel %vm289_vm14, %v973_v24, 0  ;;  %v1104_v27 = vsel %vm289_vm14, %v1099_v26, 0  ;;  %v1971_v24 = vld [vmem:[%s2481_s5 + $0x10] sm:$0xff]  }
 0xd5a   :  { %1878 = vmatpush3.bf16.xpose.msra.mxu0 %v978_v25  ;;  %v1972_v25 = vld [vmem:[%s2481_s5 + $0x18] sm:$0xff]  }
 0xd5b   :  { %1889 = vmatprep.subr.bf16.mxu0 %v2071_v6 }
 0xd5c   :  { %v1097_v28 = vpop.permute.xlu1 %1096 }
 0xd61   :  { %1880 = vmatmul.mubr.msk.bf16.vlgmr.msra.gmra.mrb[20].mxu0 %vm289_vm14, %v2338_v23 }
 0xd62   :  { %1890 = vmatpush3.bf16.xpose.msra.mxu0 %v1104_v27  ;;  %1891 = vmatprep.mubr.msk.bf16.mxu0 %vm2072_vm1, %v2071_v6 }
 0xd63   :  { %1901 = vmatprep.subr.bf16.mxu0 %v2071_v6 }
 0xd69   :  { %1892 = vmatmul.mubr.msk.bf16.vlgmr.msra.gmra.mrb[24].mxu0 %vm289_vm14, %v1097_v28 }
 0xd6a   :  { %1903 = vmatprep.mubr.msk.bf16.mxu0 %vm2072_vm1, %v2071_v6  ;;  %1902 = vmatpush3.bf16.msra.mxu0 %v1972_v25 }
 0xd6b   :  { %1913 = vmatprep.subr.bf16.mxu0 %v2071_v6 }
 0xe34   :  { %v1014_v29 = vpop.f32.mrb[20].mxu0 }
 0xe35   :  { %v1021_v30 = vmul.f32 0.25, %v1014_v29  ;;  %v1881_v31 = vpop.f32.mrb[21].mxu0 }
 0xe36   :  { %v1017_v32 = vpop.f32.mrb[22].mxu0 }
 0xe37   :  { %v1022_v33 = vmul.f32 0.25, %v1017_v32  ;;  %v1882_v34 = vpop.f32.mrb[23].mxu0  ;;  %v1023_v35 = vadd.f32 %v1021_v30, %v2212_v13 }
 0xe39   :  { %v1025_v36 = vsel %vm289_vm14, %v1023_v35, -inf  ;;  %v1024_v37 = vadd.f32 %v1022_v33, %v2217_v19 }
 0xe3a   :  { %1026 = vmax.xlane.f32.xlu0 %v1025_v36 }
 0xe3b   :  { %v1028_v38 = vsel %vm289_vm14, %v1024_v37, -inf }
 0xe3c   :  { %1029 = vmax.xlane.f32.xlu1 %v1028_v38  ;;  %v1140_v39 = vpop.f32.mrb[24].mxu0 }
 0xe3d   :  { %v1147_v40 = vmul.f32 0.25, %v1140_v39  ;;  %v1893_v41 = vpop.f32.mrb[25].mxu0 }
 0xe3e   :  { %v1143_v42 = vpop.f32.mrb[26].mxu0 }
 0xe3f   :  { %v1148_v43 = vmul.f32 0.25, %v1143_v42  ;;  %v1894_v44 = vpop.f32.mrb[27].mxu0  ;;  %v1149_v45 = vadd.f32 %v1147_v40, %v2212_v13  ;;  %v1713_v40 = vld [vmem:[%s2479_s3 + $0xc] ss:$0 sm:$0xff] }
 0xe41   :  { %v1151_v46 = vsel %vm289_vm14, %v1149_v45, -inf  ;;  %v1150_v47 = vadd.f32 %v1148_v43, %v2217_v19 }
 0xe42   :  { %1152 = vmax.xlane.f32.xlu0 %v1151_v46 }
 0xe43   :  { %v1154_v58 = vsel %vm289_vm14, %v1150_v47, -inf }
 0xe46   :  { %1155 = vmax.xlane.f32.xlu0 %v1154_v58 }
 0xec7   :  { %v1027_v59 = vpop.xlane.xlu0 %1026 }
 0xec8   :  { %v1031_v48 = vsub.f32 %v1023_v35, %v1027_v59 }
 0xec9   :  { %v1030_v49 = vpop.xlane.xlu1 %1029 }
 0xeca   :  { %v1033_v50 = vmul.f32 1.442695, %v1031_v48  ;;  %v1032_v51 = vsub.f32 %v1024_v37, %v1030_v49 }
 0xecc   :  { %2013 = vpow2.f32 %v1033_v50  ;;  %v1035_v52 = vmul.f32 1.442695, %v1032_v51 }
 0xece   :  { %2015 = vpow2.f32 %v1035_v52 }
 0xecf   :  { %v1153_v53 = vpop.xlane.xlu0 %1152 }
 0xed0   :  { %v1157_v54 = vsub.f32 %v1149_v45, %v1153_v53 }
 0xed2   :  { %v1159_v55 = vmul.f32 1.442695, %v1157_v54 }
 0xed3   :  { %v1156_v13 = vpop.xlane.xlu0 %1155 }
 0xed4   :  { %2017 = vpow2.f32 %v1159_v55  ;;  %v1158_v56 = vsub.f32 %v1150_v47, %v1156_v13 }
 0xed6   :  { %v2014_v57 = vpop.eup %2013  ;;  %v1161_v19 = vmul.f32 1.442695, %v1158_v56 }
 0xed7   :  { %v1037_v60 = vsel %vm289_vm14, %v2014_v57, 0.0 }
 0xed8   :  { %v2016_v61 = vpop.eup %2015  ;;  %2019 = vpow2.f32 %v1161_v19  ;;  %1038 = vadd.xlane.f32.xlu1 %v1037_v60  ;;  %v1974_v60 = vld [vmem:[%s2482_s6 + $0x18] sm:$0xff]  }
 0xed9   :  { %v1040_v62 = vsel %vm289_vm14, %v2016_v61, 0.0 }
 0xeda   :  { %1041 = vadd.xlane.f32.xlu0 %v1040_v62 }
 0xede   :  { %v2018_v63 = vpop.eup %2017 }
 0xedf   :  { %v1163_v0 = vsel %vm289_vm14, %v2018_v63, 0.0 }
 0xee0   :  { %1164 = vadd.xlane.f32.xlu1 %v1163_v0 }
 0xee2   :  { %v2020_v1 = vpop.eup %2019 }
 0xee3   :  { %v1166_v2 = vsel %vm289_vm14, %v2020_v1, 0.0 }
 0xee4   :  { %1167 = vadd.xlane.f32.xlu0 %v1166_v2 }
 0xef1   :  { %1048 = vrot.lane.b32.xlu1 %v2338_v23, %s2077_s12 }
 0xefa   :  { %1174 = vrot.lane.b32.xlu0 %v2338_v23, %s2076_s1 }
 0xf65   :  { %v1039_v3 = vpop.xlane.xlu1 %1038 }
 0xf66   :  { %2021 = vrcp.f32 %v1039_v3 }
 0xf67   :  { %v1042_v4 = vpop.xlane.xlu0 %1041 }
 0xf68   :  { %2023 = vrcp.f32 %v1042_v4  ;;  %v1714_v4 = vld [vmem:[%s2479_s3 + $0xd] ss:$0 sm:$0xff] }
 0xf6d   :  { %v1165_v5 = vpop.xlane.xlu1 %1164 }
 0xf6e   :  { %2025 = vrcp.f32 %v1165_v5 }
 0xf70   :  { %v2022_v7 = vpop.eup %2021 }
 0xf71   :  { %v1049_v8 = vpop.permute.xlu1 %1048  ;;  %v1168_v9 = vpop.xlane.xlu0 %1167  ;;  %v1044_v14 = vmul.f32 %v2022_v7, %v2014_v57 }
 0xf72   :  { %v2024_v10 = vpop.eup %2023  ;;  %2027 = vrcp.f32 %v1168_v9  ;;  %1884 = vmatpush3.bf16.msra.mxu1 %v1049_v8 }
 0xf73   :  { %v1046_v15 = vmul.f32 %v2024_v10, %v2016_v61  ;;  %1895 = vmatprep.subr.bf16.mxu1 %v2071_v6  ;;  %v1715_v10 = vld [vmem:[%s2479_s3 + $0xe] ss:$0 sm:$0xff] }
 0xf75   :  { %v1175_v16 = vpop.permute.xlu0 %1174  ;;  %v1047_v17 = vpack.c.bf16 %v1046_v15, %v1044_v14 }
 0xf77   :  { %1886 = vmatmul.mubr.msk.bf16.vlgmr.msra.gmra.mrb[24].mxu1 %vm289_vm14, %v1047_v17 }
 0xf78   :  { %1896 = vmatpush3.bf16.msra.mxu1 %v1175_v16  ;;  %1897 = vmatprep.mubr.msk.bf16.mxu1 %vm2072_vm1, %v2071_v6  ;;  %v2026_v18 = vpop.eup %2025 }
 0xf79   :  { %1907 = vmatprep.subr.bf16.mxu1 %v2071_v6  ;;  %v1170_v21 = vmul.f32 %v2026_v18, %v2018_v63  ;;  %v1975_v18 = vld [vmem:[%s2483_s7 + $0x20] sm:$0xff]  }
 0xf7c   :  { %v2028_v20 = vpop.eup %2027 }
 0xf7d   :  { %v1172_v22 = vmul.f32 %v2028_v20, %v2020_v1  ;;  %v1976_v20 = vld [vmem:[%s2483_s7 + $0x28] sm:$0xff]  }
 0xf7f   :  { %v1173_v23 = vpack.c.bf16 %v1172_v22, %v1170_v21  ;;  %v1977_v21 = vld [vmem:[%s2483_s7 + $0x30] sm:$0xff]   ;;  %v1978_v22 = vld [vmem:[%s2483_s7 + $0x38] sm:$0xff]  }
 0xf81   :  { %1898 = vmatmul.mubr.msk.bf16.vlgmr.msra.gmra.mrb[28].mxu1 %vm289_vm14, %v1173_v23  ;;  %v1716_v23 = vld [vmem:[%s2479_s3 + $0xf] ss:$0 sm:$0xff] }
 0xf82   :  { %1909 = vmatprep.mubr.msk.bf16.mxu1 %vm2072_vm1, %v2071_v6  ;;  %1908 = vmatpush3.bf16.msra.mxu1 %v1971_v24 }
 0xf83   :  { %1921 = vmatprep.subr.bf16.mxu1 %v2071_v6 }
0x104a   :  { %v1088_v26 = vpop.f32.mrb[24].mxu1 }
0x104b   :  { %v1887_v27 = vpop.f32.mrb[25].mxu1 }
0x104c   :  { %v1091_v28 = vpop.f32.mrb[26].mxu1 }
0x104d   :  { %v1095_v29 = vpack.c.bf16 %v1091_v28, %v1088_v26  ;;  %v1888_v30 = vpop.f32.mrb[27].mxu1 }
0x104f   :  { %1910 = vmatmul.mubr.msk.bf16.vlgmr.msra.gmra.mrb[32].mxu1 %vm289_vm14, %v1095_v29 }
0x1050   :  { %1929 = vmatprep.mubr.msk.bf16.mxu1 %vm2072_vm1, %v2071_v6  ;;  %1922 = vmatpush3.bf16.msra.mxu1 %v1975_v18 }
0x1051   :  { %1923 = vmatprep.subr.bf16.mxu1 %v2071_v6 }
0x1054   :  { %v1214_v31 = vpop.f32.mrb[28].mxu1  ;;  %1924 = vmatpush3.bf16.msra.mxu1 %v1976_v20 }
0x1055   :  { %v1899_v32 = vpop.f32.mrb[29].mxu1  ;;  %1925 = vmatprep.subr.bf16.mxu1 %v2071_v6 }
0x1056   :  { %v1217_v33 = vpop.f32.mrb[30].mxu1 }
0x1057   :  { %v1221_v34 = vpack.c.bf16 %v1217_v33, %v1214_v31  ;;  %v1900_v35 = vpop.f32.mrb[31].mxu1 }
0x1058   :  { %1926 = vmatpush3.bf16.msra.mxu1 %v1977_v21 }
0x1059   :  { %1904 = vmatmul.mubr.msk.bf16.vlgmr.msra.gmra.mrb[28].mxu0 %vm289_vm14, %v1221_v34  ;;  %1927 = vmatprep.subr.bf16.mxu1 %v2071_v6 }
0x105a   :  { %1917 = vmatprep.mubr.msk.bf16.mxu0 %vm2072_vm1, %v2071_v6 }
0x105c   :  { %1928 = vmatpush3.bf16.msra.mxu1 %v1978_v22 }
0x1122   :  { %v1315_v36 = vpop.f32.mrb[32].mxu1 }
0x1123   :  { %v1911_v37 = vpop.f32.mrb[33].mxu1 }
0x1124   :  { %v1318_v38 = vpop.f32.mrb[34].mxu1 }
0x1125   :  { %v1912_v39 = vpop.f32.mrb[35].mxu1 }
0x112c   :  { %v1265_v41 = vpop.f32.mrb[28].mxu0 }
0x112d   :  { %v1316_v42 = vadd.f32 %v1315_v36, %v1265_v41  ;;  %v1905_v43 = vpop.f32.mrb[29].mxu0 }
0x112e   :  { %v1268_v44 = vpop.f32.mrb[30].mxu0 }
0x112f   :  { %v1326_v45 = vadd.f32 %v1713_v40, %v1316_v42  ;;  %v1319_v46 = vadd.f32 %v1318_v38, %v1268_v44  ;;  %v1906_v47 = vpop.f32.mrb[31].mxu0 }
0x1131   :  { %v1327_v58 = vadd.f32 %v1713_v40, %v1319_v46  ;;  %v1328_v59 = vadd.f32 %v1326_v45, %v2326_v11 }
0x1133   :  { %v1330_v48 = vsel %vm154_vm13, %v1328_v59, 0.0  ;;  %v1329_v49 = vadd.f32 %v1327_v58, %v2328_v12  ;;  %v1973_v12 = vld [vmem:[%s2482_s6 + $0x10] sm:$0xff]  }
0x1134   :  { %1331 = vadd.xlane.f32.xlu1 %v1330_v48  ;;  %1914 = vmatpush3.bf16.msra.mxu0 %v1973_v12 }
0x1135   :  { %v1333_v50 = vsel %vm154_vm13, %v1329_v49, 0.0  ;;  %1915 = vmatprep.subr.bf16.mxu0 %v2071_v6 }
0x1136   :  { %1334 = vadd.xlane.f32.xlu0 %v1333_v50 }
0x1138   :  { %1916 = vmatpush3.bf16.msra.mxu0 %v1974_v60 }
0x1139   :  { %1933 = vmatprep.subr.bf16.mxu0 %v2071_v6 }
0x11c1   :  { %v1332_v51 = vpop.xlane.xlu1 %1331 }
0x11c2   :  { %v1336_v52 = vmul.f32 0.03125, %v1332_v51 }
0x11c3   :  { %v1335_v53 = vpop.xlane.xlu0 %1334 }
0x11c4   :  { %v1338_v54 = vsub.f32 %v1328_v59, %v1336_v52  ;;  %v1337_v55 = vmul.f32 0.03125, %v1335_v53  ;;  %v1720_v59 = vld [vmem:[%s2479_s3 + $0x10] ss:$0 sm:$0xff] }
0x11c6   :  { %v1339_v13 = vsub.f32 %v1329_v49, %v1337_v55  ;;  %v1340_v56 = vmul.f32 %v1338_v54, %v1338_v54 }
0x11c8   :  { %v1342_v57 = vsel %vm154_vm13, %v1340_v56, 0.0  ;;  %v1341_v19 = vmul.f32 %v1339_v13, %v1339_v13 }
0x11c9   :  { %1343 = vadd.xlane.f32.xlu1 %v1342_v57 }
0x11ca   :  { %v1345_v11 = vsel %vm154_vm13, %v1341_v19, 0.0 }
0x11cb   :  { %1346 = vadd.xlane.f32.xlu0 %v1345_v11 }
0x1256   :  { %v1344_v61 = vpop.xlane.xlu1 %1343 }
0x1257   :  { %v1348_v62 = vmul.f32 0.03125, %v1344_v61 }
0x1258   :  { %v1347_v63 = vpop.xlane.xlu0 %1346 }
0x1259   :  { %v1350_v0 = vadd.f32 1e-12, %v1348_v62  ;;  %v1349_v1 = vmul.f32 0.03125, %v1347_v63 }
0x125b   :  { %2029 = vrsqrt.f32 %v1350_v0  ;;  %v1351_v2 = vadd.f32 1e-12, %v1349_v1 }
0x125d   :  { %2031 = vrsqrt.f32 %v1351_v2  ;;  %v1979_v2 = vld [vmem:[%s2481_s5 + $0x20] sm:$0xff]  }
0x1265   :  { %v2030_v3 = vpop.eup %2029 }
0x1266   :  { %v1354_v5 = vmul.f32 %v2030_v3, %v1338_v54  ;;  %v1980_v3 = vld [vmem:[%s2481_s5 + $0x28] sm:$0xff]  }
0x1267   :  { %v2032_v7 = vpop.eup %2031 }
0x1268   :  { %v1360_v8 = vmul.f32 %v1714_v4, %v1354_v5  ;;  %v1355_v9 = vmul.f32 %v2032_v7, %v1339_v13 }
0x126a   :  { %v1361_v14 = vmul.f32 %v1714_v4, %v1355_v9  ;;  %v1366_v15 = vadd.f32 %v1715_v10, %v1360_v8 }
0x126c   :  { %v1367_v16 = vadd.f32 %v1715_v10, %v1361_v14 }
0x126e   :  { %v1368_v17 = vpack.c.bf16 %v1367_v16, %v1366_v15 }
0x1270   :  { %1918 = vmatmul.mubr.msk.bf16.vlgmr.msra.gmra.mrb[32].mxu0 %vm154_vm13, %v1368_v17 }
0x1271   :  { %1937 = vmatprep.mubr.msk.bf16.mxu0 %vm2072_vm1, %v2071_v6  ;;  %1934 = vmatpush3.bf16.msra.mxu0 %v1979_v2 }
0x1272   :  { %1935 = vmatprep.subr.bf16.mxu0 %v2071_v6  ;;  %v1727_v6 = vld [vmem:[%s2479_s3 + $0x12] ss:$0 sm:$0xff] }
0x1275   :  { %1936 = vmatpush3.bf16.msra.mxu0 %v1980_v3 }
0x1343   :  { %v1422_v24 = vpop.f32.mrb[32].mxu0 }
0x1344   :  { %v1423_v25 = vadd.f32 %v1716_v23, %v1422_v24  ;;  %v1919_v26 = vpop.f32.mrb[33].mxu0 }
0x1345   :  { %v1425_v27 = vpop.f32.mrb[34].mxu0 }
0x1346   :  { %v1429_v28 = vmul.f32 %v1423_v25, %v1423_v25  ;;  %v1426_v29 = vadd.f32 %v1716_v23, %v1425_v27  ;;  %v1920_v30 = vpop.f32.mrb[35].mxu0 }
0x1348   :  { %v1431_v31 = vmul.f32 %v1429_v28, %v1423_v25  ;;  %v1430_v32 = vmul.f32 %v1426_v29, %v1426_v29 }
0x134a   :  { %v1433_v33 = vmul.f32 0.044715, %v1431_v31  ;;  %v1432_v34 = vmul.f32 %v1430_v32, %v1426_v29 }
0x134c   :  { %v1435_v35 = vadd.f32 %v1433_v33, %v1423_v25  ;;  %v1434_v36 = vmul.f32 0.044715, %v1432_v34 }
0x134e   :  { %v1437_v37 = vmul.f32 0.7978846, %v1435_v35  ;;  %v1436_v38 = vadd.f32 %v1434_v36, %v1426_v29 }
0x1350   :  { %2033 = vtanh.f32 %v1437_v37  ;;  %v1438_v39 = vmul.f32 0.7978846, %v1436_v38 }
0x1352   :  { %2035 = vtanh.f32 %v1438_v39 }
0x135a   :  { %v2034_v40 = vpop.eup %2033 }
0x135b   :  { %v1441_v41 = vadd.f32 1.0, %v2034_v40 }
0x135c   :  { %v2036_v42 = vpop.eup %2035 }
0x135d   :  { %v1443_v43 = vmul.f32 0.5, %v1441_v41  ;;  %v1442_v44 = vadd.f32 1.0, %v2036_v42 }
0x135f   :  { %v1444_v45 = vmul.f32 0.5, %v1442_v44  ;;  %v1445_v46 = vmul.f32 %v1443_v43, %v1423_v25  ;;  %v1732_v25 = vld [vmem:[%s2479_s3 + $0x2] ss:$0 sm:$0xff] }
0x1361   :  { %v1446_v47 = vmul.f32 %v1444_v45, %v1426_v29 }
0x1363   :  { %v1447_v58 = vpack.c.bf16 %v1446_v47, %v1445_v46 }
0x1365   :  { %1930 = vmatmul.mubr.msk.bf16.vlgmr.msra.gmra.mrb[36].mxu1 %vm792_vm15, %v1447_v58 }
0x1438   :  { %v1513_v48 = vpop.f32.mrb[36].mxu1 }
0x1439   :  { %v1514_v49 = vadd.f32 %v1720_v59, %v1513_v48  ;;  %v1931_v50 = vpop.f32.mrb[37].mxu1 }
0x143a   :  { %v1516_v51 = vpop.f32.mrb[38].mxu1 }
0x143b   :  { %v1517_v52 = vadd.f32 %v1720_v59, %v1516_v51  ;;  %v1932_v53 = vpop.f32.mrb[39].mxu1  ;;  %v1520_v54 = vadd.f32 %v1514_v49, %v1366_v15  ;;  %v1726_v15 = vld [vmem:[%s2479_s3 + $0x11] ss:$0 sm:$0xff] }
0x143d   :  { %v1522_v55 = vsel %vm154_vm13, %v1520_v54, 0.0  ;;  %v1521_v13 = vadd.f32 %v1517_v52, %v1367_v16 }
0x143e   :  { %1523 = vadd.xlane.f32.xlu1 %v1522_v55 }
0x143f   :  { %v1525_v56 = vsel %vm154_vm13, %v1521_v13, 0.0 }
0x1440   :  { %1526 = vadd.xlane.f32.xlu0 %v1525_v56 }
0x14cb   :  { %v1524_v57 = vpop.xlane.xlu1 %1523 }
0x14cc   :  { %v1528_v19 = vmul.f32 0.03125, %v1524_v57 }
0x14cd   :  { %v1527_v11 = vpop.xlane.xlu0 %1526 }
0x14ce   :  { %v1530_v12 = vsub.f32 %v1520_v54, %v1528_v19  ;;  %v1529_v60 = vmul.f32 0.03125, %v1527_v11 }
0x14d0   :  { %v1531_v61 = vsub.f32 %v1521_v13, %v1529_v60  ;;  %v1532_v62 = vmul.f32 %v1530_v12, %v1530_v12 }
0x14d2   :  { %v1534_v63 = vsel %vm154_vm13, %v1532_v62, 0.0  ;;  %v1533_v0 = vmul.f32 %v1531_v61, %v1531_v61 }
0x14d3   :  { %1535 = vadd.xlane.f32.xlu1 %v1534_v63 }
0x14d4   :  { %v1537_v1 = vsel %vm154_vm13, %v1533_v0, 0.0 }
0x14d5   :  { %1538 = vadd.xlane.f32.xlu0 %v1537_v1 }
0x1560   :  { %v1536_v4 = vpop.xlane.xlu1 %1535 }
0x1561   :  { %v1540_v5 = vmul.f32 0.03125, %v1536_v4 }
0x1562   :  { %v1539_v7 = vpop.xlane.xlu0 %1538 }
0x1563   :  { %v1542_v8 = vadd.f32 1e-12, %v1540_v5  ;;  %v1541_v9 = vmul.f32 0.03125, %v1539_v7 }
0x1565   :  { %2037 = vrsqrt.f32 %v1542_v8  ;;  %v1543_v10 = vadd.f32 1e-12, %v1541_v9 }
0x1567   :  { %2039 = vrsqrt.f32 %v1543_v10 }
0x156f   :  { %v2038_v14 = vpop.eup %2037 }
0x1570   :  { %v1546_v16 = vmul.f32 %v2038_v14, %v1530_v12 }
0x1571   :  { %v2040_v17 = vpop.eup %2039 }
0x1572   :  { %v1552_v18 = vmul.f32 %v1726_v15, %v1546_v16  ;;  %v1547_v20 = vmul.f32 %v2040_v17, %v1531_v61 }
0x1574   :  { %v1553_v21 = vmul.f32 %v1726_v15, %v1547_v20  ;;  %v1558_v22 = vadd.f32 %v1727_v6, %v1552_v18 }
0x1576   :  { %v1559_v23 = vadd.f32 %v1727_v6, %v1553_v21 }
0x1578   :  { %v1560_v24 = vpack.c.bf16 %v1559_v23, %v1558_v22 }
0x157a   :  { %1938 = vmatmul.mubr.msk.bf16.vlgmr.msra.gmra.mrb[36].mxu0 %vm154_vm13, %v1560_v24 }
0x164d   :  { %v1620_v26 = vpop.f32.mrb[36].mxu0 }
0x164e   :  { %v1621_v27 = vadd.f32 %v1732_v25, %v1620_v26  ;;  %v1939_v28 = vpop.f32.mrb[37].mxu0 }
0x164f   :  { %v1623_v29 = vpop.f32.mrb[38].mxu0 }
0x1650   :  { %2041 = vtanh.f32 %v1621_v27  ;;  %v1624_v30 = vadd.f32 %v1732_v25, %v1623_v29  ;;  %v1940_v31 = vpop.f32.mrb[39].mxu0 }
0x1652   :  { %2043 = vtanh.f32 %v1624_v30 }
0x165a   :  { %v2042_v32 = vpop.eup %2041 }
0x165b   :  { %1630 = vst.msk [vmem:[#allocation2] sm:$0x1] %vm1629_vm0, %v2042_v32 }
0x165c   :  { %v2044_v33 = vpop.eup %2043 }
0x165d   :  { %1631 = vst.msk [vmem:[#allocation2 + $0x1] sm:$0x1] %vm1629_vm0, %v2044_v33 }
0x165e   :  { %2056 = shalt.err (!%p2053_p4)
}
0x165f   :  { %s2057_s13 = scalar_lea.hbm %s2484_s8, 32 }
0x1660   :  { %p2058_p5 = scmp.ne.s32.totalorder %s2484_s8, %s2057_s13  ;;  %p2061_p6 = scmp.lt.u32.totalorder %s2057_s13, %s2484_s8 }
0x1662   :  { %p2063_p7 = pnand %p2061_p6, %p2058_p5 }
0x1664   :  { %2066 = shalt.err (!%p2063_p7)
}
0x1665   :  { %1641 = dma.vmem_to_hbm [thread:$0]  %s1639_s10, 32, %s2484_s8, [#allocation3]  }
0x1666   :  { %2067 = dma.done.wait [#allocation3], 32  }
0x1667   :  { %2068 = vsyncadd [#allocation3], 4294967264 }
0x1668   :  { %1645 = vsyncpa [#allocation3], 1 }

</bundles_post_ra>
